<compile_context>
chip_gen: v6e
topology: v6e:2x2x1
jax: 0.10.0
libtpu: 0.0.40
codegen_flags: <defaults>
</compile_context>

<pallas_src>
import functools

import jax
import jax.numpy as jnp
from jax.experimental import pallas as pl
from jax.experimental.pallas import tpu as pltpu


BLOCK_CFG = [
    # (in_dim, out_dim, kernel_size, dilation)
    (1, 64, 3, 1),
    (64, 128, 5, 2),
    (128, 64, 5, 4),
    (64, 32, 3, 8),
]

_LANES = 128


# ------------------------- host-side weight packing -------------------------

def _pack_params(params):
    """Pack every weight/bias into ONE (R, 128) f32 carrier (single DMA).

    Each tensor sits at an 8-row-aligned offset of a 128-lane slab so the
    in-kernel static slices are aligned, zero-cost views.  Returns
    (carrier, meta, cfg) with meta[i] = (row_offset, rows, cols) in packing
    order and cfg = per-block (cin, cout, K, dilation).
    """
    slabs, meta, cfg = [], [], []
    cursor = 0

    def add(w):
        nonlocal cursor
        w = jnp.asarray(w, jnp.float32)
        r, c = w.shape
        rp = ((r + 7) // 8) * 8
        slab = jnp.zeros((rp, _LANES), jnp.float32).at[:r, :c].set(w)
        slabs.append(slab)
        meta.append((cursor, r, c))
        cursor += rp

    for p in params["blocks"]:
        K, dil = p["kernel_size"], p["dilation"]
        _, cin, cout = p["w1"].shape                       # (K, Cin, Cout)
        cfg.append((cin, cout, K, dil))
        add(p["w1"].reshape(K * cin, cout))                # conv1: row = tap*Cin + cin
        add(p["b1"].reshape(1, cout))
        add(p["w2"].reshape(K * cout, cout))               # conv2: row = tap*Cout + c
        add(p["b2"].reshape(1, cout))
        add(p["wd"])                                       # 1x1 downsample (Cin, Cout)
        add(p["bd"].reshape(1, cout))
    add(params["w_out"].T)                                 # head weight stored as (1, 32)
    add(params["b_out"].reshape(1, 1))

    carrier = jnp.concatenate(slabs, axis=0)
    return carrier, tuple(meta), tuple(cfg)


# ----------------------------- Pallas kernel -------------------------------

def _wslice(w_ref, entry):
    """Static (8-row-aligned) view of one packed weight inside the carrier."""
    off, r, c = entry
    return w_ref[off:off + r, 0:c]


def _stacked_causal_dot(x, w_stacked, K, dil):
    """Causal dilated conv over a (TB, L, Cin) tile as ONE MXU matmul.

    w_stacked is (K*Cin, Cout) with row index = tap*Cin + cin (host-packed).
    """
    TB, L, cin = x.shape
    cout = w_stacked.shape[-1]
    pad = (K - 1) * dil
    xp = jnp.concatenate([jnp.zeros((TB, pad, cin), x.dtype), x], axis=1)
    stack = jnp.concatenate(
        [xp[:, tap * dil: tap * dil + L, :] for tap in range(K)], axis=-1)
    out = jnp.dot(stack.reshape(TB * L, K * cin), w_stacked,
                  preferred_element_type=jnp.float32)
    return out.reshape(TB, L, cout)


def generator_kernel(x_ref, w_ref, o_ref, *, block_cfg, meta, tb, seq_len):
    """Fused Generator forward for one tile of TB batch elements.

    x_ref: (TB, L, 1)   w_ref: packed (R, 128) carrier   o_ref: (TB, L)
    """
    TB, L = tb, seq_len
    x = x_ref[...].astype(jnp.float32)                     # (TB, L, 1)

    mi = 0
    for (cin, cout, K, dil) in block_cfg:
        w1 = _wslice(w_ref, meta[mi])
        b1 = _wslice(w_ref, meta[mi + 1]).reshape(1, 1, cout)
        w2 = _wslice(w_ref, meta[mi + 2])
        b2 = _wslice(w_ref, meta[mi + 3]).reshape(1, 1, cout)
        wd = _wslice(w_ref, meta[mi + 4])
        bd = _wslice(w_ref, meta[mi + 5]).reshape(1, 1, cout)
        mi += 6
        pad = (K - 1) * dil

        # ---- conv1 (causal, dilated) + residual 1x1 on the block input ----
        if cin == 1:
            # Single input channel: outer products.  Broadcast the padded
            # column across `cout` lanes ONCE; each tap is then a
            # sublane-shifted slice * weight-row MAC on the VPU (no MXU).
            xpb = jnp.broadcast_to(
                jnp.concatenate(
                    [jnp.zeros((TB, pad, 1), jnp.float32), x], axis=1),
                (TB, L + pad, cout))
            h = jnp.broadcast_to(b1, (TB, L, cout))
            for tap in range(K):
                h = h + xpb[:, tap * dil: tap * dil + L, :] * w1[tap].reshape(1, 1, cout)
            res = xpb[:, pad:, :] * wd.reshape(1, 1, cout) + bd
        else:
            h = _stacked_causal_dot(x, w1, K, dil) + b1
            res = jnp.dot(x.reshape(TB * L, cin), wd,
                          preferred_element_type=jnp.float32
                          ).reshape(TB, L, cout) + bd

        h = jnp.maximum(h, 0.2 * h)          # LeakyReLU(0.2); slope in (0,1)
        # TODO(synk): Dropout(p=0.2) -> identity (inference semantics).

        # ---- conv2 (causal, dilated), MXU path ----
        h = _stacked_causal_dot(h, w2, K, dil) + b2
        h = jnp.maximum(h, 0.2 * h)          # LeakyReLU(0.2)
        # TODO(synk): Dropout(p=0.2) -> identity (inference semantics).

        x = jnp.maximum(h + res, 0.0)        # ReLU(residual add)

    # ---- final Linear(32, 1) head: lane-reduce, lane-dense (TB, L) store ----
    w_out = _wslice(w_ref, meta[mi]).reshape(1, 1, 32)     # stored transposed
    b_out = _wslice(w_ref, meta[mi + 1])                   # (1, 1)
    y = jnp.sum(x * w_out, axis=-1) + b_out                # (TB, L)
    o_ref[...] = y.astype(o_ref.dtype)


# ------------------------------ JAX wrapper ---------------------------------

def _choose_tb(B, L):
    """Batch-fold factor per grid step.

    Small batches (like the B=2 demo) collapse to one grid step; larger
    batches use an 8-aligned tile that keeps >=128 MXU rows while capping the
    live shifted-stack size (avoids flipping into a spill-bound regime).
    """
    if B * L <= 512:
        return B
    for tb in (64, 32, 16, 8):
        if B % tb == 0 and tb * L <= 2048:
            return tb
    return B


def generator_forward(noise, params):
    """noise: (B, L, 1) -> (B, L, 1). Single fused pallas_call, one weight DMA."""
    B, L, _ = noise.shape
    TB = _choose_tb(B, L)
    carrier, meta, cfg = _pack_params(params)

    kern = functools.partial(generator_kernel, block_cfg=cfg, meta=meta,
                             tb=TB, seq_len=L)
    out2d = pl.pallas_call(
        kern,
        out_shape=jax.ShapeDtypeStruct((B, L), noise.dtype),
        grid=(B // TB,),
        in_specs=[
            pl.BlockSpec((TB, L, 1), lambda b: (b, 0, 0)),
            pl.BlockSpec(carrier.shape, lambda b: (0, 0)),   # resident weights
        ],
        out_specs=pl.BlockSpec((TB, L), lambda b: (b, 0)),
        compiler_params=pltpu.CompilerParams(
            dimension_semantics=("parallel",)),
    )(noise, carrier)
    return out2d.reshape(B, L, 1)


# --------------------------- parameter construction -------------------------

def _weight_norm_fold(v, g):
    """PyTorch nn.utils.weight_norm (dim=0): w = g * v / ||v||_{dims 1,2}."""
    norm = jnp.sqrt(jnp.sum(v * v, axis=(1, 2), keepdims=True))
    return (g.reshape(-1, 1, 1) / norm) * v


def make_params(key):
    params = {"blocks": []}
    for (cin, cout, k, dil) in BLOCK_CFG:
        key, *ks = jax.random.split(key, 9)
        # conv1 (weight-normalized): PyTorch layout (Cout, Cin, K)
        v1 = jax.random.normal(ks[0], (cout, cin, k), jnp.float32) * 0.1
        g1 = jax.random.uniform(ks[1], (cout,), jnp.float32, 0.5, 1.5)
        w1 = _weight_norm_fold(v1, g1).transpose(2, 1, 0)    # -> (K, Cin, Cout)
        b1 = jax.random.normal(ks[2], (cout,), jnp.float32) * 0.1
        # conv2 (weight-normalized)
        v2 = jax.random.normal(ks[3], (cout, cout, k), jnp.float32) * 0.1
        g2 = jax.random.uniform(ks[4], (cout,), jnp.float32, 0.5, 1.5)
        w2 = _weight_norm_fold(v2, g2).transpose(2, 1, 0)    # -> (K, Cout, Cout)
        b2 = jax.random.normal(ks[5], (cout,), jnp.float32) * 0.1
        # downsample 1x1 conv: (Cout, Cin, 1) -> (Cin, Cout)
        wd = (jax.random.normal(ks[6], (cout, cin, 1), jnp.float32) * 0.1
              )[:, :, 0].T
        bd = jax.random.normal(ks[7], (cout,), jnp.float32) * 0.1
        params["blocks"].append(
            dict(w1=w1, b1=b1, w2=w2, b2=b2, wd=wd, bd=bd,
                 kernel_size=k, dilation=dil))
    key, k1, k2 = jax.random.split(key, 3)
    params["w_out"] = jax.random.normal(k1, (32, 1), jnp.float32) * 0.1
    params["b_out"] = jax.random.normal(k2, (1,), jnp.float32) * 0.1
    return params


# --------------------------- pure-JAX reference ------------------------------

def _causal_conv_ref(x, w, b, dilation):
    K = w.shape[0]
    pad = (K - 1) * dilation
    xp = jnp.pad(x, ((0, 0), (pad, 0), (0, 0)))
    L = x.shape[1]
    out = b[None, None, :]
    for tap in range(K):
        out = out + jnp.einsum("blc,cd->bld",
                               xp[:, tap * dilation:tap * dilation + L, :],
                               w[tap])
    return out


def generator_ref(noise, params):
    x = noise
    for p in params["blocks"]:
        h = _causal_conv_ref(x, p["w1"], p["b1"], p["dilation"])
        h = jnp.where(h > 0, h, 0.2 * h)
        h = _causal_conv_ref(h, p["w2"], p["b2"], p["dilation"])
        h = jnp.where(h > 0, h, 0.2 * h)
        res = jnp.einsum("blc,cd->bld", x, p["wd"]) + p["bd"]
        x = jnp.maximum(h + res, 0.0)
    return jnp.einsum("blc,cd->bld", x, params["w_out"]) + params["b_out"]


# ----------------------------------- main ------------------------------------

if __name__ == "__main__":
    key = jax.random.PRNGKey(0)
    kp, kx = jax.random.split(key)

    B, L = 2, 16                      # batch, sample_size (seq length)
    params = make_params(kp)
    noise = jax.random.normal(kx, (B, L, 1), jnp.float32)

    out = jax.block_until_ready(generator_forward(noise, params))
    assert out.shape == (B, L, 1), out.shape

    ref = jax.block_until_ready(generator_ref(noise, params))
    assert jnp.allclose(out, ref, rtol=1e-4, atol=1e-4), (
        float(jnp.max(jnp.abs(out - ref))))

    print("KERNEL_OK")
</pallas_src>

<mosaic_0001>
module attributes {stable_mosaic.version = 11 : i64} {
  func.func @generator_kernel(%arg0: i32, %arg1: memref<2x16x1xf32, #tpu.memory_space<vmem>>, %arg2: memref<2784x128xf32, #tpu.memory_space<vmem>>, %arg3: memref<2x16xf32, #tpu.memory_space<vmem>>) attributes {dimension_semantics = [#tpu.dimension_semantics<parallel>], iteration_bounds = array<i64: 1>, scalar_prefetch = 0 : i64, scratch_operands = 0 : i64, tpu.core_type = #tpu.core_type<tc>, window_params = [{transform_indices = @transform_0, window_bounds = array<i64: 2, 16, 1>}, {pipeline_mode = #tpu.pipeline_mode<synchronous>, transform_indices = @transform_1, window_bounds = array<i64: 2784, 128>}, {transform_indices = @transform_2, window_bounds = array<i64: 2, 16>}]} {
    %c0 = arith.constant 0 : index
    %c0_0 = arith.constant 0 : index
    %c0_1 = arith.constant 0 : index
    %0 = vector.load %arg1[%c0, %c0_0, %c0_1] : memref<2x16x1xf32, #tpu.memory_space<vmem>>, vector<2x16x1xf32>
    %c0_2 = arith.constant 0 : index
    %c0_3 = arith.constant 0 : index
    %1 = vector.load %arg2[%c0_2, %c0_3] : memref<2784x128xf32, #tpu.memory_space<vmem>>, vector<3x64xf32>
    %c8 = arith.constant 8 : index
    %c0_4 = arith.constant 0 : index
    %2 = vector.load %arg2[%c8, %c0_4] : memref<2784x128xf32, #tpu.memory_space<vmem>>, vector<1x64xf32>
    %3 = vector.shape_cast %2 : vector<1x64xf32> to vector<1x1x64xf32>
    %c16 = arith.constant 16 : index
    %c0_5 = arith.constant 0 : index
    %4 = vector.load %arg2[%c16, %c0_5] : memref<2784x128xf32, #tpu.memory_space<vmem>>, vector<192x64xf32>
    %c208 = arith.constant 208 : index
    %c0_6 = arith.constant 0 : index
    %5 = vector.load %arg2[%c208, %c0_6] : memref<2784x128xf32, #tpu.memory_space<vmem>>, vector<1x64xf32>
    %6 = vector.shape_cast %5 : vector<1x64xf32> to vector<1x1x64xf32>
    %c216 = arith.constant 216 : index
    %c0_7 = arith.constant 0 : index
    %7 = vector.load %arg2[%c216, %c0_7] : memref<2784x128xf32, #tpu.memory_space<vmem>>, vector<1x64xf32>
    %c224 = arith.constant 224 : index
    %c0_8 = arith.constant 0 : index
    %8 = vector.load %arg2[%c224, %c0_8] : memref<2784x128xf32, #tpu.memory_space<vmem>>, vector<1x64xf32>
    %9 = vector.shape_cast %8 : vector<1x64xf32> to vector<1x1x64xf32>
    %cst = arith.constant 0.000000e+00 : f32
    %10 = vector.broadcast %cst : f32 to vector<2x2x1xf32>
    %11 = tpu.concatenate %10, %0 in 1 : vector<2x2x1xf32>, vector<2x16x1xf32> -> vector<2x18x1xf32>
    %12 = vector.shape_cast %11 : vector<2x18x1xf32> to vector<2x18x1xf32>
    %13 = vector.broadcast %12 : vector<2x18x1xf32> to vector<2x18x64xf32>
    %14 = vector.shape_cast %3 : vector<1x1x64xf32> to vector<1x1x64xf32>
    %15 = vector.broadcast %14 : vector<1x1x64xf32> to vector<2x16x64xf32>
    %16 = vector.extract_strided_slice %13 {offsets = [0, 0, 0], sizes = [2, 16, 64], strides = [1, 1, 1]} : vector<2x18x64xf32> to vector<2x16x64xf32>
    %17 = vector.extract_strided_slice %1 {offsets = [0, 0], sizes = [1, 64], strides = [1, 1]} : vector<3x64xf32> to vector<1x64xf32>
    %18 = vector.shape_cast %17 : vector<1x64xf32> to vector<64xf32>
    %19 = vector.shape_cast %18 : vector<64xf32> to vector<1x1x64xf32>
    %20 = vector.broadcast %19 : vector<1x1x64xf32> to vector<2x16x64xf32>
    %21 = arith.mulf %16, %20 : vector<2x16x64xf32>
    %22 = arith.addf %15, %21 : vector<2x16x64xf32>
    %23 = vector.extract_strided_slice %13 {offsets = [0, 1, 0], sizes = [2, 16, 64], strides = [1, 1, 1]} : vector<2x18x64xf32> to vector<2x16x64xf32>
    %24 = vector.extract_strided_slice %1 {offsets = [1, 0], sizes = [1, 64], strides = [1, 1]} : vector<3x64xf32> to vector<1x64xf32>
    %25 = vector.shape_cast %24 : vector<1x64xf32> to vector<64xf32>
    %26 = vector.shape_cast %25 : vector<64xf32> to vector<1x1x64xf32>
    %27 = vector.broadcast %26 : vector<1x1x64xf32> to vector<2x16x64xf32>
    %28 = arith.mulf %23, %27 : vector<2x16x64xf32>
    %29 = arith.addf %22, %28 : vector<2x16x64xf32>
    %30 = vector.extract_strided_slice %13 {offsets = [0, 2, 0], sizes = [2, 16, 64], strides = [1, 1, 1]} : vector<2x18x64xf32> to vector<2x16x64xf32>
    %31 = vector.extract_strided_slice %1 {offsets = [2, 0], sizes = [1, 64], strides = [1, 1]} : vector<3x64xf32> to vector<1x64xf32>
    %32 = vector.shape_cast %31 : vector<1x64xf32> to vector<64xf32>
    %33 = vector.shape_cast %32 : vector<64xf32> to vector<1x1x64xf32>
    %34 = vector.broadcast %33 : vector<1x1x64xf32> to vector<2x16x64xf32>
    %35 = arith.mulf %30, %34 : vector<2x16x64xf32>
    %36 = arith.addf %29, %35 : vector<2x16x64xf32>
    %37 = vector.extract_strided_slice %13 {offsets = [0, 2, 0], sizes = [2, 16, 64], strides = [1, 1, 1]} : vector<2x18x64xf32> to vector<2x16x64xf32>
    %38 = vector.shape_cast %7 : vector<1x64xf32> to vector<1x1x64xf32>
    %39 = vector.broadcast %38 : vector<1x1x64xf32> to vector<2x16x64xf32>
    %40 = arith.mulf %37, %39 : vector<2x16x64xf32>
    %41 = vector.broadcast %9 : vector<1x1x64xf32> to vector<2x16x64xf32>
    %42 = arith.addf %40, %41 : vector<2x16x64xf32>
    %cst_9 = arith.constant 2.000000e-01 : f32
    %43 = vector.broadcast %cst_9 : f32 to vector<2x16x64xf32>
    %44 = arith.mulf %43, %36 : vector<2x16x64xf32>
    %45 = arith.maximumf %36, %44 : vector<2x16x64xf32>
    %cst_10 = arith.constant 0.000000e+00 : f32
    %46 = vector.broadcast %cst_10 : f32 to vector<2x2x64xf32>
    %47 = tpu.concatenate %46, %45 in 1 : vector<2x2x64xf32>, vector<2x16x64xf32> -> vector<2x18x64xf32>
    %48 = vector.extract_strided_slice %47 {offsets = [0, 0, 0], sizes = [2, 16, 64], strides = [1, 1, 1]} : vector<2x18x64xf32> to vector<2x16x64xf32>
    %49 = vector.extract_strided_slice %47 {offsets = [0, 1, 0], sizes = [2, 16, 64], strides = [1, 1, 1]} : vector<2x18x64xf32> to vector<2x16x64xf32>
    %50 = vector.extract_strided_slice %47 {offsets = [0, 2, 0], sizes = [2, 16, 64], strides = [1, 1, 1]} : vector<2x18x64xf32> to vector<2x16x64xf32>
    %51 = tpu.concatenate %48, %49, %50 in 2 : vector<2x16x64xf32>, vector<2x16x64xf32>, vector<2x16x64xf32> -> vector<2x16x192xf32>
    %52 = vector.shape_cast %51 : vector<2x16x192xf32> to vector<32x192xf32>
    %cst_11 = arith.constant dense<0.000000e+00> : vector<32x64xf32>
    %53 = tpu.matmul %52, %4, %cst_11 {dimension_numbers = #tpu.dot_dimension_numbers<[1], [0], [0], [1], [0, 0, 1, 1], [], []>} : vector<32x192xf32>, vector<192x64xf32>, vector<32x64xf32> -> vector<32x64xf32>
    %54 = vector.shape_cast %53 : vector<32x64xf32> to vector<2x16x64xf32>
    %55 = vector.broadcast %6 : vector<1x1x64xf32> to vector<2x16x64xf32>
    %56 = arith.addf %54, %55 : vector<2x16x64xf32>
    %cst_12 = arith.constant 2.000000e-01 : f32
    %57 = vector.broadcast %cst_12 : f32 to vector<2x16x64xf32>
    %58 = arith.mulf %57, %56 : vector<2x16x64xf32>
    %59 = arith.maximumf %56, %58 : vector<2x16x64xf32>
    %60 = arith.addf %59, %42 : vector<2x16x64xf32>
    %cst_13 = arith.constant 0.000000e+00 : f32
    %61 = vector.broadcast %cst_13 : f32 to vector<2x16x64xf32>
    %62 = arith.maximumf %60, %61 : vector<2x16x64xf32>
    %c232 = arith.constant 232 : index
    %c0_14 = arith.constant 0 : index
    %63 = vector.load %arg2[%c232, %c0_14] : memref<2784x128xf32, #tpu.memory_space<vmem>>, vector<320x128xf32>
    %c552 = arith.constant 552 : index
    %c0_15 = arith.constant 0 : index
    %64 = vector.load %arg2[%c552, %c0_15] : memref<2784x128xf32, #tpu.memory_space<vmem>>, vector<1x128xf32>
    %65 = vector.shape_cast %64 : vector<1x128xf32> to vector<1x1x128xf32>
    %c560 = arith.constant 560 : index
    %c0_16 = arith.constant 0 : index
    %66 = vector.load %arg2[%c560, %c0_16] : memref<2784x128xf32, #tpu.memory_space<vmem>>, vector<640x128xf32>
    %c1200 = arith.constant 1200 : index
    %c0_17 = arith.constant 0 : index
    %67 = vector.load %arg2[%c1200, %c0_17] : memref<2784x128xf32, #tpu.memory_space<vmem>>, vector<1x128xf32>
    %68 = vector.shape_cast %67 : vector<1x128xf32> to vector<1x1x128xf32>
    %c1208 = arith.constant 1208 : index
    %c0_18 = arith.constant 0 : index
    %69 = vector.load %arg2[%c1208, %c0_18] : memref<2784x128xf32, #tpu.memory_space<vmem>>, vector<64x128xf32>
    %c1272 = arith.constant 1272 : index
    %c0_19 = arith.constant 0 : index
    %70 = vector.load %arg2[%c1272, %c0_19] : memref<2784x128xf32, #tpu.memory_space<vmem>>, vector<1x128xf32>
    %71 = vector.shape_cast %70 : vector<1x128xf32> to vector<1x1x128xf32>
    %cst_20 = arith.constant 0.000000e+00 : f32
    %72 = vector.broadcast %cst_20 : f32 to vector<2x8x64xf32>
    %73 = tpu.concatenate %72, %62 in 1 : vector<2x8x64xf32>, vector<2x16x64xf32> -> vector<2x24x64xf32>
    %74 = vector.extract_strided_slice %73 {offsets = [0, 0, 0], sizes = [2, 16, 64], strides = [1, 1, 1]} : vector<2x24x64xf32> to vector<2x16x64xf32>
    %75 = vector.extract_strided_slice %73 {offsets = [0, 2, 0], sizes = [2, 16, 64], strides = [1, 1, 1]} : vector<2x24x64xf32> to vector<2x16x64xf32>
    %76 = vector.extract_strided_slice %73 {offsets = [0, 4, 0], sizes = [2, 16, 64], strides = [1, 1, 1]} : vector<2x24x64xf32> to vector<2x16x64xf32>
    %77 = vector.extract_strided_slice %73 {offsets = [0, 6, 0], sizes = [2, 16, 64], strides = [1, 1, 1]} : vector<2x24x64xf32> to vector<2x16x64xf32>
    %78 = vector.extract_strided_slice %73 {offsets = [0, 8, 0], sizes = [2, 16, 64], strides = [1, 1, 1]} : vector<2x24x64xf32> to vector<2x16x64xf32>
    %79 = tpu.concatenate %74, %75, %76, %77, %78 in 2 : vector<2x16x64xf32>, vector<2x16x64xf32>, vector<2x16x64xf32>, vector<2x16x64xf32>, vector<2x16x64xf32> -> vector<2x16x320xf32>
    %80 = vector.shape_cast %79 : vector<2x16x320xf32> to vector<32x320xf32>
    %cst_21 = arith.constant dense<0.000000e+00> : vector<32x128xf32>
    %81 = tpu.matmul %80, %63, %cst_21 {dimension_numbers = #tpu.dot_dimension_numbers<[1], [0], [0], [1], [0, 0, 1, 1], [], []>} : vector<32x320xf32>, vector<320x128xf32>, vector<32x128xf32> -> vector<32x128xf32>
    %82 = vector.shape_cast %81 : vector<32x128xf32> to vector<2x16x128xf32>
    %83 = vector.broadcast %65 : vector<1x1x128xf32> to vector<2x16x128xf32>
    %84 = arith.addf %82, %83 : vector<2x16x128xf32>
    %85 = vector.shape_cast %62 : vector<2x16x64xf32> to vector<32x64xf32>
    %cst_22 = arith.constant dense<0.000000e+00> : vector<32x128xf32>
    %86 = tpu.matmul %85, %69, %cst_22 {dimension_numbers = #tpu.dot_dimension_numbers<[1], [0], [0], [1], [0, 0, 1, 1], [], []>} : vector<32x64xf32>, vector<64x128xf32>, vector<32x128xf32> -> vector<32x128xf32>
    %87 = vector.shape_cast %86 : vector<32x128xf32> to vector<2x16x128xf32>
    %88 = vector.broadcast %71 : vector<1x1x128xf32> to vector<2x16x128xf32>
    %89 = arith.addf %87, %88 : vector<2x16x128xf32>
    %cst_23 = arith.constant 2.000000e-01 : f32
    %90 = vector.broadcast %cst_23 : f32 to vector<2x16x128xf32>
    %91 = arith.mulf %90, %84 : vector<2x16x128xf32>
    %92 = arith.maximumf %84, %91 : vector<2x16x128xf32>
    %cst_24 = arith.constant 0.000000e+00 : f32
    %93 = vector.broadcast %cst_24 : f32 to vector<2x8x128xf32>
    %94 = tpu.concatenate %93, %92 in 1 : vector<2x8x128xf32>, vector<2x16x128xf32> -> vector<2x24x128xf32>
    %95 = vector.extract_strided_slice %94 {offsets = [0, 0, 0], sizes = [2, 16, 128], strides = [1, 1, 1]} : vector<2x24x128xf32> to vector<2x16x128xf32>
    %96 = vector.extract_strided_slice %94 {offsets = [0, 2, 0], sizes = [2, 16, 128], strides = [1, 1, 1]} : vector<2x24x128xf32> to vector<2x16x128xf32>
    %97 = vector.extract_strided_slice %94 {offsets = [0, 4, 0], sizes = [2, 16, 128], strides = [1, 1, 1]} : vector<2x24x128xf32> to vector<2x16x128xf32>
    %98 = vector.extract_strided_slice %94 {offsets = [0, 6, 0], sizes = [2, 16, 128], strides = [1, 1, 1]} : vector<2x24x128xf32> to vector<2x16x128xf32>
    %99 = vector.extract_strided_slice %94 {offsets = [0, 8, 0], sizes = [2, 16, 128], strides = [1, 1, 1]} : vector<2x24x128xf32> to vector<2x16x128xf32>
    %100 = tpu.concatenate %95, %96, %97, %98, %99 in 2 : vector<2x16x128xf32>, vector<2x16x128xf32>, vector<2x16x128xf32>, vector<2x16x128xf32>, vector<2x16x128xf32> -> vector<2x16x640xf32>
    %101 = vector.shape_cast %100 : vector<2x16x640xf32> to vector<32x640xf32>
    %cst_25 = arith.constant dense<0.000000e+00> : vector<32x128xf32>
    %102 = tpu.matmul %101, %66, %cst_25 {dimension_numbers = #tpu.dot_dimension_numbers<[1], [0], [0], [1], [0, 0, 1, 1], [], []>} : vector<32x640xf32>, vector<640x128xf32>, vector<32x128xf32> -> vector<32x128xf32>
    %103 = vector.shape_cast %102 : vector<32x128xf32> to vector<2x16x128xf32>
    %104 = vector.broadcast %68 : vector<1x1x128xf32> to vector<2x16x128xf32>
    %105 = arith.addf %103, %104 : vector<2x16x128xf32>
    %cst_26 = arith.constant 2.000000e-01 : f32
    %106 = vector.broadcast %cst_26 : f32 to vector<2x16x128xf32>
    %107 = arith.mulf %106, %105 : vector<2x16x128xf32>
    %108 = arith.maximumf %105, %107 : vector<2x16x128xf32>
    %109 = arith.addf %108, %89 : vector<2x16x128xf32>
    %cst_27 = arith.constant 0.000000e+00 : f32
    %110 = vector.broadcast %cst_27 : f32 to vector<2x16x128xf32>
    %111 = arith.maximumf %109, %110 : vector<2x16x128xf32>
    %c1280 = arith.constant 1280 : index
    %c0_28 = arith.constant 0 : index
    %112 = vector.load %arg2[%c1280, %c0_28] : memref<2784x128xf32, #tpu.memory_space<vmem>>, vector<640x64xf32>
    %c1920 = arith.constant 1920 : index
    %c0_29 = arith.constant 0 : index
    %113 = vector.load %arg2[%c1920, %c0_29] : memref<2784x128xf32, #tpu.memory_space<vmem>>, vector<1x64xf32>
    %114 = vector.shape_cast %113 : vector<1x64xf32> to vector<1x1x64xf32>
    %c1928 = arith.constant 1928 : index
    %c0_30 = arith.constant 0 : index
    %115 = vector.load %arg2[%c1928, %c0_30] : memref<2784x128xf32, #tpu.memory_space<vmem>>, vector<320x64xf32>
    %c2248 = arith.constant 2248 : index
    %c0_31 = arith.constant 0 : index
    %116 = vector.load %arg2[%c2248, %c0_31] : memref<2784x128xf32, #tpu.memory_space<vmem>>, vector<1x64xf32>
    %117 = vector.shape_cast %116 : vector<1x64xf32> to vector<1x1x64xf32>
    %c2256 = arith.constant 2256 : index
    %c0_32 = arith.constant 0 : index
    %118 = vector.load %arg2[%c2256, %c0_32] : memref<2784x128xf32, #tpu.memory_space<vmem>>, vector<128x64xf32>
    %c2384 = arith.constant 2384 : index
    %c0_33 = arith.constant 0 : index
    %119 = vector.load %arg2[%c2384, %c0_33] : memref<2784x128xf32, #tpu.memory_space<vmem>>, vector<1x64xf32>
    %120 = vector.shape_cast %119 : vector<1x64xf32> to vector<1x1x64xf32>
    %cst_34 = arith.constant 0.000000e+00 : f32
    %121 = vector.broadcast %cst_34 : f32 to vector<2x16x128xf32>
    %122 = tpu.concatenate %121, %111 in 1 : vector<2x16x128xf32>, vector<2x16x128xf32> -> vector<2x32x128xf32>
    %123 = vector.extract_strided_slice %122 {offsets = [0, 0, 0], sizes = [2, 16, 128], strides = [1, 1, 1]} : vector<2x32x128xf32> to vector<2x16x128xf32>
    %124 = vector.extract_strided_slice %122 {offsets = [0, 4, 0], sizes = [2, 16, 128], strides = [1, 1, 1]} : vector<2x32x128xf32> to vector<2x16x128xf32>
    %125 = vector.extract_strided_slice %122 {offsets = [0, 8, 0], sizes = [2, 16, 128], strides = [1, 1, 1]} : vector<2x32x128xf32> to vector<2x16x128xf32>
    %126 = vector.extract_strided_slice %122 {offsets = [0, 12, 0], sizes = [2, 16, 128], strides = [1, 1, 1]} : vector<2x32x128xf32> to vector<2x16x128xf32>
    %127 = vector.extract_strided_slice %122 {offsets = [0, 16, 0], sizes = [2, 16, 128], strides = [1, 1, 1]} : vector<2x32x128xf32> to vector<2x16x128xf32>
    %128 = tpu.concatenate %123, %124, %125, %126, %127 in 2 : vector<2x16x128xf32>, vector<2x16x128xf32>, vector<2x16x128xf32>, vector<2x16x128xf32>, vector<2x16x128xf32> -> vector<2x16x640xf32>
    %129 = vector.shape_cast %128 : vector<2x16x640xf32> to vector<32x640xf32>
    %cst_35 = arith.constant dense<0.000000e+00> : vector<32x64xf32>
    %130 = tpu.matmul %129, %112, %cst_35 {dimension_numbers = #tpu.dot_dimension_numbers<[1], [0], [0], [1], [0, 0, 1, 1], [], []>} : vector<32x640xf32>, vector<640x64xf32>, vector<32x64xf32> -> vector<32x64xf32>
    %131 = vector.shape_cast %130 : vector<32x64xf32> to vector<2x16x64xf32>
    %132 = vector.broadcast %114 : vector<1x1x64xf32> to vector<2x16x64xf32>
    %133 = arith.addf %131, %132 : vector<2x16x64xf32>
    %134 = vector.shape_cast %111 : vector<2x16x128xf32> to vector<32x128xf32>
    %cst_36 = arith.constant dense<0.000000e+00> : vector<32x64xf32>
    %135 = tpu.matmul %134, %118, %cst_36 {dimension_numbers = #tpu.dot_dimension_numbers<[1], [0], [0], [1], [0, 0, 1, 1], [], []>} : vector<32x128xf32>, vector<128x64xf32>, vector<32x64xf32> -> vector<32x64xf32>
    %136 = vector.shape_cast %135 : vector<32x64xf32> to vector<2x16x64xf32>
    %137 = vector.broadcast %120 : vector<1x1x64xf32> to vector<2x16x64xf32>
    %138 = arith.addf %136, %137 : vector<2x16x64xf32>
    %cst_37 = arith.constant 2.000000e-01 : f32
    %139 = vector.broadcast %cst_37 : f32 to vector<2x16x64xf32>
    %140 = arith.mulf %139, %133 : vector<2x16x64xf32>
    %141 = arith.maximumf %133, %140 : vector<2x16x64xf32>
    %cst_38 = arith.constant 0.000000e+00 : f32
    %142 = vector.broadcast %cst_38 : f32 to vector<2x16x64xf32>
    %143 = tpu.concatenate %142, %141 in 1 : vector<2x16x64xf32>, vector<2x16x64xf32> -> vector<2x32x64xf32>
    %144 = vector.extract_strided_slice %143 {offsets = [0, 0, 0], sizes = [2, 16, 64], strides = [1, 1, 1]} : vector<2x32x64xf32> to vector<2x16x64xf32>
    %145 = vector.extract_strided_slice %143 {offsets = [0, 4, 0], sizes = [2, 16, 64], strides = [1, 1, 1]} : vector<2x32x64xf32> to vector<2x16x64xf32>
    %146 = vector.extract_strided_slice %143 {offsets = [0, 8, 0], sizes = [2, 16, 64], strides = [1, 1, 1]} : vector<2x32x64xf32> to vector<2x16x64xf32>
    %147 = vector.extract_strided_slice %143 {offsets = [0, 12, 0], sizes = [2, 16, 64], strides = [1, 1, 1]} : vector<2x32x64xf32> to vector<2x16x64xf32>
    %148 = vector.extract_strided_slice %143 {offsets = [0, 16, 0], sizes = [2, 16, 64], strides = [1, 1, 1]} : vector<2x32x64xf32> to vector<2x16x64xf32>
    %149 = tpu.concatenate %144, %145, %146, %147, %148 in 2 : vector<2x16x64xf32>, vector<2x16x64xf32>, vector<2x16x64xf32>, vector<2x16x64xf32>, vector<2x16x64xf32> -> vector<2x16x320xf32>
    %150 = vector.shape_cast %149 : vector<2x16x320xf32> to vector<32x320xf32>
    %cst_39 = arith.constant dense<0.000000e+00> : vector<32x64xf32>
    %151 = tpu.matmul %150, %115, %cst_39 {dimension_numbers = #tpu.dot_dimension_numbers<[1], [0], [0], [1], [0, 0, 1, 1], [], []>} : vector<32x320xf32>, vector<320x64xf32>, vector<32x64xf32> -> vector<32x64xf32>
    %152 = vector.shape_cast %151 : vector<32x64xf32> to vector<2x16x64xf32>
    %153 = vector.broadcast %117 : vector<1x1x64xf32> to vector<2x16x64xf32>
    %154 = arith.addf %152, %153 : vector<2x16x64xf32>
    %cst_40 = arith.constant 2.000000e-01 : f32
    %155 = vector.broadcast %cst_40 : f32 to vector<2x16x64xf32>
    %156 = arith.mulf %155, %154 : vector<2x16x64xf32>
    %157 = arith.maximumf %154, %156 : vector<2x16x64xf32>
    %158 = arith.addf %157, %138 : vector<2x16x64xf32>
    %cst_41 = arith.constant 0.000000e+00 : f32
    %159 = vector.broadcast %cst_41 : f32 to vector<2x16x64xf32>
    %160 = arith.maximumf %158, %159 : vector<2x16x64xf32>
    %c2392 = arith.constant 2392 : index
    %c0_42 = arith.constant 0 : index
    %161 = vector.load %arg2[%c2392, %c0_42] : memref<2784x128xf32, #tpu.memory_space<vmem>>, vector<192x32xf32>
    %c2584 = arith.constant 2584 : index
    %c0_43 = arith.constant 0 : index
    %162 = vector.load %arg2[%c2584, %c0_43] : memref<2784x128xf32, #tpu.memory_space<vmem>>, vector<1x32xf32>
    %163 = vector.shape_cast %162 : vector<1x32xf32> to vector<1x1x32xf32>
    %c2592 = arith.constant 2592 : index
    %c0_44 = arith.constant 0 : index
    %164 = vector.load %arg2[%c2592, %c0_44] : memref<2784x128xf32, #tpu.memory_space<vmem>>, vector<96x32xf32>
    %c2688 = arith.constant 2688 : index
    %c0_45 = arith.constant 0 : index
    %165 = vector.load %arg2[%c2688, %c0_45] : memref<2784x128xf32, #tpu.memory_space<vmem>>, vector<1x32xf32>
    %166 = vector.shape_cast %165 : vector<1x32xf32> to vector<1x1x32xf32>
    %c2696 = arith.constant 2696 : index
    %c0_46 = arith.constant 0 : index
    %167 = vector.load %arg2[%c2696, %c0_46] : memref<2784x128xf32, #tpu.memory_space<vmem>>, vector<64x32xf32>
    %c2760 = arith.constant 2760 : index
    %c0_47 = arith.constant 0 : index
    %168 = vector.load %arg2[%c2760, %c0_47] : memref<2784x128xf32, #tpu.memory_space<vmem>>, vector<1x32xf32>
    %169 = vector.shape_cast %168 : vector<1x32xf32> to vector<1x1x32xf32>
    %cst_48 = arith.constant 0.000000e+00 : f32
    %170 = vector.broadcast %cst_48 : f32 to vector<2x16x64xf32>
    %171 = tpu.concatenate %170, %160 in 1 : vector<2x16x64xf32>, vector<2x16x64xf32> -> vector<2x32x64xf32>
    %172 = vector.extract_strided_slice %171 {offsets = [0, 0, 0], sizes = [2, 16, 64], strides = [1, 1, 1]} : vector<2x32x64xf32> to vector<2x16x64xf32>
    %173 = vector.extract_strided_slice %171 {offsets = [0, 8, 0], sizes = [2, 16, 64], strides = [1, 1, 1]} : vector<2x32x64xf32> to vector<2x16x64xf32>
    %174 = vector.extract_strided_slice %171 {offsets = [0, 16, 0], sizes = [2, 16, 64], strides = [1, 1, 1]} : vector<2x32x64xf32> to vector<2x16x64xf32>
    %175 = tpu.concatenate %172, %173, %174 in 2 : vector<2x16x64xf32>, vector<2x16x64xf32>, vector<2x16x64xf32> -> vector<2x16x192xf32>
    %176 = vector.shape_cast %175 : vector<2x16x192xf32> to vector<32x192xf32>
    %cst_49 = arith.constant dense<0.000000e+00> : vector<32x32xf32>
    %177 = tpu.matmul %176, %161, %cst_49 {dimension_numbers = #tpu.dot_dimension_numbers<[1], [0], [0], [1], [0, 0, 1, 1], [], []>} : vector<32x192xf32>, vector<192x32xf32>, vector<32x32xf32> -> vector<32x32xf32>
    %178 = vector.shape_cast %177 : vector<32x32xf32> to vector<2x16x32xf32>
    %179 = vector.broadcast %163 : vector<1x1x32xf32> to vector<2x16x32xf32>
    %180 = arith.addf %178, %179 : vector<2x16x32xf32>
    %181 = vector.shape_cast %160 : vector<2x16x64xf32> to vector<32x64xf32>
    %cst_50 = arith.constant dense<0.000000e+00> : vector<32x32xf32>
    %182 = tpu.matmul %181, %167, %cst_50 {dimension_numbers = #tpu.dot_dimension_numbers<[1], [0], [0], [1], [0, 0, 1, 1], [], []>} : vector<32x64xf32>, vector<64x32xf32>, vector<32x32xf32> -> vector<32x32xf32>
    %183 = vector.shape_cast %182 : vector<32x32xf32> to vector<2x16x32xf32>
    %184 = vector.broadcast %169 : vector<1x1x32xf32> to vector<2x16x32xf32>
    %185 = arith.addf %183, %184 : vector<2x16x32xf32>
    %cst_51 = arith.constant 2.000000e-01 : f32
    %186 = vector.broadcast %cst_51 : f32 to vector<2x16x32xf32>
    %187 = arith.mulf %186, %180 : vector<2x16x32xf32>
    %188 = arith.maximumf %180, %187 : vector<2x16x32xf32>
    %cst_52 = arith.constant 0.000000e+00 : f32
    %189 = vector.broadcast %cst_52 : f32 to vector<2x16x32xf32>
    %190 = tpu.concatenate %189, %188 in 1 : vector<2x16x32xf32>, vector<2x16x32xf32> -> vector<2x32x32xf32>
    %191 = vector.extract_strided_slice %190 {offsets = [0, 0, 0], sizes = [2, 16, 32], strides = [1, 1, 1]} : vector<2x32x32xf32> to vector<2x16x32xf32>
    %192 = vector.extract_strided_slice %190 {offsets = [0, 8, 0], sizes = [2, 16, 32], strides = [1, 1, 1]} : vector<2x32x32xf32> to vector<2x16x32xf32>
    %193 = vector.extract_strided_slice %190 {offsets = [0, 16, 0], sizes = [2, 16, 32], strides = [1, 1, 1]} : vector<2x32x32xf32> to vector<2x16x32xf32>
    %194 = tpu.concatenate %191, %192, %193 in 2 : vector<2x16x32xf32>, vector<2x16x32xf32>, vector<2x16x32xf32> -> vector<2x16x96xf32>
    %195 = vector.shape_cast %194 : vector<2x16x96xf32> to vector<32x96xf32>
    %cst_53 = arith.constant dense<0.000000e+00> : vector<32x32xf32>
    %196 = tpu.matmul %195, %164, %cst_53 {dimension_numbers = #tpu.dot_dimension_numbers<[1], [0], [0], [1], [0, 0, 1, 1], [], []>} : vector<32x96xf32>, vector<96x32xf32>, vector<32x32xf32> -> vector<32x32xf32>
    %197 = vector.shape_cast %196 : vector<32x32xf32> to vector<2x16x32xf32>
    %198 = vector.broadcast %166 : vector<1x1x32xf32> to vector<2x16x32xf32>
    %199 = arith.addf %197, %198 : vector<2x16x32xf32>
    %cst_54 = arith.constant 2.000000e-01 : f32
    %200 = vector.broadcast %cst_54 : f32 to vector<2x16x32xf32>
    %201 = arith.mulf %200, %199 : vector<2x16x32xf32>
    %202 = arith.maximumf %199, %201 : vector<2x16x32xf32>
    %203 = arith.addf %202, %185 : vector<2x16x32xf32>
    %cst_55 = arith.constant 0.000000e+00 : f32
    %204 = vector.broadcast %cst_55 : f32 to vector<2x16x32xf32>
    %205 = arith.maximumf %203, %204 : vector<2x16x32xf32>
    %c2768 = arith.constant 2768 : index
    %c0_56 = arith.constant 0 : index
    %206 = vector.load %arg2[%c2768, %c0_56] : memref<2784x128xf32, #tpu.memory_space<vmem>>, vector<1x32xf32>
    %207 = vector.shape_cast %206 : vector<1x32xf32> to vector<1x1x32xf32>
    %c2776 = arith.constant 2776 : index
    %c0_57 = arith.constant 0 : index
    %208 = vector.load %arg2[%c2776, %c0_57] : memref<2784x128xf32, #tpu.memory_space<vmem>>, vector<1x1xf32>
    %209 = vector.broadcast %207 : vector<1x1x32xf32> to vector<2x16x32xf32>
    %210 = arith.mulf %205, %209 : vector<2x16x32xf32>
    %cst_58 = arith.constant dense<0.000000e+00> : vector<2x16xf32>
    %211 = vector.multi_reduction <add>, %210, %cst_58 [2] : vector<2x16x32xf32> to vector<2x16xf32>
    %212 = vector.broadcast %208 : vector<1x1xf32> to vector<2x16xf32>
    %213 = arith.addf %211, %212 : vector<2x16xf32>
    %c0_59 = arith.constant 0 : index
    %c0_60 = arith.constant 0 : index
    %214 = vector.load %arg3[%c0_59, %c0_60] : memref<2x16xf32, #tpu.memory_space<vmem>>, vector<2x16xf32>
    tpu.vector_store %arg3[%c0_59, %c0_60], %213 {strides = array<i32>} : memref<2x16xf32, #tpu.memory_space<vmem>>, vector<2x16xf32>,
    return
  }
  func.func @transform_0(%arg0: i32) -> (i32, i32, i32) {
    %c0_i32 = arith.constant 0 : i32
    %c0_i32_0 = arith.constant 0 : i32
    %c0_i32_1 = arith.constant 0 : i32
    return %arg0, %c0_i32, %c0_i32_0 : i32, i32, i32
  }
  func.func @transform_1(%arg0: i32) -> (i32, i32) {
    %c0_i32 = arith.constant 0 : i32
    %c0_i32_0 = arith.constant 0 : i32
    %c0_i32_1 = arith.constant 0 : i32
    return %c0_i32, %c0_i32_0 : i32, i32
  }
  func.func @transform_2(%arg0: i32) -> (i32, i32) {
    %c0_i32 = arith.constant 0 : i32
    %c0_i32_0 = arith.constant 0 : i32
    return %arg0, %c0_i32 : i32, i32
  }
}

</mosaic_0001>

<bundles_post_ra>
// kernel: tpu_custom_call.1
= control target key start
LH: loop header
LB: loop body
LE: loop exit
PB: predicated region body
PF: predicated region fallthrough
CT: control target
= control target key end

     0   :  { %7 = vsyncpa [#allocation3], 0  ;;  %s3636_s0 = inlined_call_operand.vmem [shape: f32[2,16,1], index: 0, kind: input, shape index: {}]   ;;  %s3637_s1 = inlined_call_operand.hbm [shape: f32[2784,128], index: 1, kind: input, shape index: {}]   ;;  %s3638_s2 = inlined_call_operand.hbm [shape: f32[2,16], index: 2, kind: output, shape index: {}]  }
   0x1   :  { %8 = vsyncpa [#allocation4], 0  ;;  %s3215_s9 = smov [#allocation2]  }
   0x2   :  { %s16_s10 = sshll.u32 %s3215_s9, 4  ;;  %s17_s10 = int_to_ptr.vmem [resolvable:$true] %s16_s10 }
   0x3   :  { %s3179_s11 = scalar_lea.vmem %s17_s10, 44544  ;;  %p3184_p1 = scmp.lt.s32.totalorder %s17_s10, %s17_s10 }
   0x4   :  { %p3180_p0 = scmp.ne.s32.totalorder %s17_s10, %s3179_s11  ;;  %p3185_p2 = scmp.lt.s32.totalorder %s3179_s11, %s3179_s11 }
   0x6   :  { %p3186_p3 = por %p3185_p2, %p3184_p1 }
   0x8   :  { %p3187_p4 = pnand %p3186_p3, %p3180_p0 }
   0xa   :  { %3190 = shalt.err (!%p3187_p4)
}
   0xb   :  { %s3216_s12 = smov 128   ;;  %s3217_s13 = smov 8  }
   0xc   :  { %22 = dma.hbm_to_vmem [thread:$0]  %s3637_s1, 44544, %s17_s10, [#allocation3], %s3216_s12, %s3216_s12, %s3217_s13  }
   0xd   :  { %3211 = dma.done.wait [#allocation3], 44544  }
   0xe   :  { %3212 = vsyncadd [#allocation3], 4294922752  ;;  %v3218_v0 = vmov 0   ;;  %v27_v1 = vld [vmem:[%s3636_s0 + $0x8] sm:$0xff]  ;;  %v26_v2 = vld [vmem:[%s3636_s0] sm:$0xff]  ;;  %vm63_vm0 = vcmask 1041408   ;;  %v96_v37 = vlaneseq }
   0xf   :  { %3160 = vset.pattern.permute.xlu1 %v3218_v0  ;;  %3159 = vset.pattern.permute.xlu0 %v3218_v0  ;;  %v28_v3 = vld [vmem:[%s3636_s0 + $0x10] sm:$0xff]  ;;  %v65_v4 = vrot.slane %v27_v1, 6  ;;  %v64_v5 = vrot.slane %v26_v2, 6  ;;  %v29_v7 = vld [vmem:[%s3636_s0 + $0x18] sm:$0xff]  ;;  %v47_v13 = vld [vmem:[#allocation2 + $0x88] sm:$0xff]  ;;  %v3219_v14 = vmov 0.0  }
  0x10   :  { %v67_v6 = vrot.slane %v28_v3, 6  ;;  %v68_v11 = vrot.slane %v29_v7, 6  ;;  %277 = vmatprep.subr.mxu0 %v3219_v14  ;;  %v46_v15 = vld [vmem:[#allocation2 + $0x80] sm:$0xff]  ;;  %v45_v16 = vld [vmem:[#allocation2 + $0x78] sm:$0xff]  ;;  %v44_v17 = vld [vmem:[#allocation2 + $0x70] sm:$0xff]  ;;  %v3282_v38 = vshrl.u32 %v96_v37, 7 }
  0x11   :  { %109 = vperm.xlu1 %3160, %v65_v4   ;;  %v72_v8 = vsel %vm63_vm0, 0.0, %v64_v5  ;;  %v66_v10 = vsel %vm63_vm0, %v64_v5, %v65_v4  ;;  %278 = vmatpush1.msra.mxu0 %v47_v13  ;;  %v43_v18 = vld [vmem:[#allocation2 + $0x68] sm:$0xff]  ;;  %v42_v19 = vld [vmem:[#allocation2 + $0x60] sm:$0xff]  ;;  %v41_v20 = vld [vmem:[#allocation2 + $0x58] sm:$0xff]  ;;  %vm132_vm1 = vcmask 1046528   ;;  %vm167_vm2 = vcmask 1045504  }
  0x12   :  { %80 = vperm.xlu0 %3159, %v72_v8   ;;  %v73_v9 = vsel %vm63_vm0, 0.0, %v67_v6  ;;  %v69_v12 = vsel %vm63_vm0, %v67_v6, %v68_v11  ;;  %279 = vmatprep.subr.mxu0 %v3219_v14  ;;  %v40_v21 = vld [vmem:[#allocation2 + $0x50] sm:$0xff]  ;;  %v39_v22 = vld [vmem:[#allocation2 + $0x48] sm:$0xff]  ;;  %v38_v23 = vld [vmem:[#allocation2 + $0x40] sm:$0xff]  ;;  %v98_v39 = vsub.s32 0, %v3282_v38  ;;  %v118_v41 = vsub.s32 1, %v3282_v38 }
  0x13   :  { %280 = vmatpush1.msra.mxu0 %v46_v15  ;;  %v37_v24 = vld [vmem:[#allocation2 + $0x38] sm:$0xff]  ;;  %v36_v25 = vld [vmem:[#allocation2 + $0x30] sm:$0xff]  ;;  %v35_v26 = vld [vmem:[#allocation2 + $0x28] sm:$0xff]  ;;  %v153_v42 = vsub.s32 2, %v3282_v38  ;;  %vm264_vm3 = vcmask 523264   ;;  %s3220_s0 = smov 64  }
  0x14   :  { %281 = vmatprep.subr.mxu0 %v3219_v14  ;;  %v34_v27 = vld [vmem:[#allocation2 + $0x20] sm:$0xff]  ;;  %v33_v28 = vld [vmem:[#allocation2 + $0x18] sm:$0xff]  ;;  %v32_v29 = vld [vmem:[#allocation2 + $0x10] sm:$0xff]  ;;  %vm563_vm4 = vcmask 1043456   ;;  %s3221_s23 = smov 32   ;;  %vm2257_vm6 = vcmask 261120  }
  0x15   :  { %89 = vperm.xlu1 %3160, %v73_v9   ;;  %282 = vmatpush1.msra.mxu0 %v45_v16  ;;  %v55_v30 = vld [vmem:[#allocation2 + $0xc8] sm:$0xff]  ;;  %v54_v31 = vld [vmem:[#allocation2 + $0xc0] sm:$0xff]  ;;  %v53_v32 = vld [vmem:[#allocation2 + $0xb8] sm:$0xff]  ;;  %vm2265_vm7 = vcmask 785408   ;;  %vm2432_vm8 = vcmask 130112   ;;  %s3222_s25 = smov [#allocation5]  }
  0x16   :  { %84 = vperm.xlu0 %3159, %v66_v10   ;;  %283 = vmatprep.subr.mxu0 %v3219_v14  ;;  %v52_v33 = vld [vmem:[#allocation2 + $0xb0] sm:$0xff]  ;;  %v51_v34 = vld [vmem:[#allocation2 + $0xa8] sm:$0xff]  ;;  %v50_v35 = vld [vmem:[#allocation2 + $0xa0] sm:$0xff]  ;;  %s2454_s26 = sshll.u32 %s3222_s25, 4  ;;  %vm2443_vm9 = vcmask 1041409   ;;  %vm2446_vm10 = vcmask 123904   ;;  %s2455_s26 = int_to_ptr.vmem [resolvable:$true] %s2454_s26 }
  0x17   :  { %284 = vmatpush1.msra.mxu0 %v44_v17  ;;  %v49_v36 = vld [vmem:[#allocation2 + $0x98] sm:$0xff]  ;;  %v30_v40 = vld [vmem:[#allocation2] sm:$0x7]  ;;  %v2463_v54 = vld [vmem:[#allocation2 + $0x8] ss:$0 sm:$0xff]  ;;  %s3191_s27 = scalar_lea.vmem %s2455_s26, 32  ;;  %p3196_p6 = scmp.lt.s32.totalorder %s2455_s26, %s2455_s26 }
  0x18   :  { %285 = vmatprep.subr.mxu0 %v3219_v14  ;;  %v99_v43 = vrot.slane %v30_v40, %v98_v39  ;;  %v119_v44 = vrot.slane %v30_v40, %v118_v41  ;;  %v154_v45 = vrot.slane %v30_v40, %v153_v42  ;;  %v3287_v46 = vld [vmem:[#allocation2 + $0xd8] ss:$0 sm:$0xff]  ;;  %v3290_v53 = vld [vmem:[#allocation2 + $0xe0] ss:$0 sm:$0xff]  ;;  %vm3422_vm5 = vmneg %vm264_vm3  ;;  %p3192_p5 = scmp.ne.s32.totalorder %s2455_s26, %s3191_s27  ;;  %p3197_p7 = scmp.lt.s32.totalorder %s3191_s27, %s3191_s27 }
  0x19   :  { %113 = vperm.xlu1 %3160, %v68_v11   ;;  %286 = vmatpush1.msra.mxu0 %v43_v18 }
  0x1a   :  { %93 = vperm.xlu0 %3159, %v69_v12   ;;  %287 = vmatprep.subr.mxu0 %v3219_v14  ;;  %p3198_p8 = por %p3197_p7, %p3196_p6 }
  0x1b   :  { %288 = vmatpush1.msra.mxu0 %v42_v19 }
  0x1c   :  { %289 = vmatprep.subr.mxu0 %v3219_v14  ;;  %p3199_p9 = pnand %p3198_p8, %p3192_p5 }
  0x1d   :  { %290 = vmatpush1.msra.mxu0 %v41_v20 }
  0x1e   :  { %291 = vmatprep.subr.mxu0 %v3219_v14 }
  0x1f   :  { %292 = vmatpush1.msra.mxu0 %v40_v21 }
  0x20   :  { %293 = vmatprep.subr.mxu0 %v3219_v14 }
  0x21   :  { %294 = vmatpush1.msra.mxu0 %v39_v22 }
  0x22   :  { %295 = vmatprep.subr.mxu0 %v3219_v14 }
  0x23   :  { %296 = vmatpush1.msra.mxu0 %v38_v23 }
  0x24   :  { %297 = vmatprep.subr.mxu0 %v3219_v14 }
  0x25   :  { %298 = vmatpush1.msra.mxu0 %v37_v24 }
  0x26   :  { %299 = vmatprep.subr.mxu0 %v3219_v14 }
  0x27   :  { %300 = vmatpush1.msra.mxu0 %v36_v25 }
  0x28   :  { %301 = vmatprep.subr.mxu0 %v3219_v14 }
  0x29   :  { %302 = vmatpush1.msra.mxu0 %v35_v26 }
  0x2a   :  { %303 = vmatprep.subr.mxu0 %v3219_v14 }
  0x2b   :  { %304 = vmatpush1.msra.mxu0 %v34_v27 }
  0x2c   :  { %305 = vmatprep.subr.mxu0 %v3219_v14 }
  0x2d   :  { %306 = vmatpush1.msra.mxu0 %v33_v28 }
  0x2e   :  { %307 = vmatprep.subr.mxu0 %v3219_v14 }
  0x2f   :  { %308 = vmatpush1.msra.mxu0 %v32_v29 }
  0x30   :  { %325 = vmatprep.subr.mxu0 %v3219_v14 }
  0x31   :  { %326 = vmatpush2.msra.mxu0 %v55_v30 }
  0x32   :  { %327 = vmatprep.subr.mxu0 %v3219_v14 }
  0x33   :  { %328 = vmatpush2.msra.mxu0 %v54_v31 }
  0x34   :  { %329 = vmatprep.subr.mxu0 %v3219_v14 }
  0x35   :  { %330 = vmatpush2.msra.mxu0 %v53_v32 }
  0x36   :  { %331 = vmatprep.subr.mxu0 %v3219_v14 }
  0x37   :  { %332 = vmatpush2.msra.mxu0 %v52_v33 }
  0x38   :  { %333 = vmatprep.subr.mxu0 %v3219_v14 }
  0x39   :  { %334 = vmatpush2.msra.mxu0 %v51_v34 }
  0x3a   :  { %335 = vmatprep.subr.mxu0 %v3219_v14 }
  0x3b   :  { %336 = vmatpush2.msra.mxu0 %v50_v35 }
  0x3c   :  { %337 = vmatprep.subr.mxu0 %v3219_v14 }
  0x3d   :  { %338 = vmatpush2.msra.mxu0 %v49_v36  ;;  %v48_v36 = vld [vmem:[#allocation2 + $0x90] sm:$0xff] }
  0x3e   :  { %339 = vmatprep.subr.mxu0 %v3219_v14 }
  0x3f   :  { %340 = vmatpush2.msra.mxu0 %v48_v36 }
  0x8c   :  { %v110_v47 = vpop.permute.xlu1 %109 }
  0x8d   :  { %v122_v48 = vmul.f32 %v119_v44, %v110_v47  ;;  %v192_v49 = vmul.f32 %v3287_v46, %v110_v47  ;;  %v81_v50 = vpop.permute.xlu0 %80  ;;  %v157_v51 = vmul.f32 %v154_v45, %v110_v47 }
  0x8e   :  { %v100_v52 = vmul.f32 %v99_v43, %v81_v50  ;;  %v120_v55 = vmul.f32 %v119_v44, %v81_v50  ;;  %v155_v56 = vmul.f32 %v154_v45, %v81_v50  ;;  %v190_v57 = vmul.f32 %v3287_v46, %v81_v50 }
  0x8f   :  { %v202_v58 = vadd.f32 %v3290_v53, %v192_v49  ;;  %v136_v60 = vrot.slane %v122_v48, 1  ;;  %v171_v62 = vrot.slane %v157_v51, 2 }
  0x90   :  { %v3294_v59 = vpop.permute.xlu1 %89  ;;  %v104_v63 = vadd.f32 %v2463_v54, %v100_v52  ;;  %v133_v2 = vrot.slane %v120_v55, 1  ;;  %v168_v3 = vrot.slane %v155_v56, 2  ;;  %v200_v4 = vadd.f32 %v3290_v53, %v190_v57 }
  0x91   :  { %v85_v61 = vpop.permute.xlu0 %84  ;;  %v387_v6 = vrot.slane %v202_v58, 2  ;;  %v102_v11 = vmul.f32 %v99_v43, %v3294_v59  ;;  %v123_v12 = vmul.f32 %v119_v44, %v3294_v59  ;;  %v158_v22 = vmul.f32 %v154_v45, %v3294_v59 }
  0x92   :  { %v101_v0 = vmul.f32 %v99_v43, %v85_v61  ;;  %v121_v1 = vmul.f32 %v119_v44, %v85_v61  ;;  %v156_v5 = vmul.f32 %v154_v45, %v85_v61  ;;  %v191_v9 = vmul.f32 %v3287_v46, %v85_v61 }
  0x93   :  { %v384_v21 = vrot.slane %v200_v4, 2  ;;  %v138_v33 = vrot.slane %v123_v12, 1  ;;  %v106_v48 = vadd.f32 %v2463_v54, %v102_v11 }
  0x94   :  { %v105_v7 = vadd.f32 %v2463_v54, %v101_v0  ;;  %v134_v8 = vrot.slane %v121_v1, 1  ;;  %v3298_v10 = vpop.permute.xlu1 %113  ;;  %v169_v13 = vrot.slane %v156_v5, 2  ;;  %v201_v18 = vadd.f32 %v3290_v53, %v191_v9 }
  0x95   :  { %v125_v15 = vmul.f32 %v119_v44, %v3298_v10  ;;  %v160_v19 = vmul.f32 %v154_v45, %v3298_v10  ;;  %v3307_v20 = vpop.permute.xlu0 %93 }
  0x96   :  { %v135_v16 = vsel %vm132_vm1, %v133_v2, %v134_v8  ;;  %v137_v17 = vsel %vm132_vm1, %v134_v8, %v136_v60  ;;  %v170_v25 = vsel %vm167_vm2, %v168_v3, %v169_v13  ;;  %v172_v26 = vsel %vm167_vm2, %v169_v13, %v171_v62 }
  0x97   :  { %v147_v23 = vadd.f32 %v135_v16, %v104_v63  ;;  %v148_v24 = vadd.f32 %v137_v17, %v105_v7  ;;  %v385_v27 = vrot.slane %v201_v18, 2  ;;  %v141_v28 = vrot.slane %v125_v15, 1 }
  0x98   :  { %v103_v30 = vmul.f32 %v99_v43, %v3307_v20  ;;  %v124_v31 = vmul.f32 %v119_v44, %v3307_v20  ;;  %v159_v32 = vmul.f32 %v154_v45, %v3307_v20  ;;  %v176_v34 = vrot.slane %v160_v19, 2 }
  0x99   :  { %v183_v29 = vadd.f32 %v172_v26, %v148_v24  ;;  %v182_v35 = vadd.f32 %v170_v25, %v147_v23  ;;  %v3316_v39 = vsel %vm167_vm2, %v384_v21, %v385_v27  ;;  %v3319_v43 = vsel %vm167_vm2, %v385_v27, %v387_v6  ;;  %v535_v21 = vld [vmem:[#allocation2 + $0x4f0] sm:$0xff] }
  0x9a   :  { %v107_v41 = vadd.f32 %v2463_v54, %v103_v30  ;;  %v139_v42 = vrot.slane %v124_v31, 1  ;;  %v174_v47 = vrot.slane %v159_v32, 2  ;;  %v173_v44 = vrot.slane %v158_v22, 2  ;;  %2939 = vmatprep.subr.mxu0 %v535_v21 }
  0x9b   :  { %v207_v40 = vmul.f32 0.2, %v183_v29  ;;  %v206_v49 = vmul.f32 0.2, %v182_v35 }
  0x9c   :  { %v140_v45 = vsel %vm132_vm1, %v138_v33, %v139_v42  ;;  %v142_v50 = vsel %vm132_vm1, %v139_v42, %v141_v28  ;;  %v175_v56 = vsel %vm167_vm2, %v173_v44, %v174_v47  ;;  %v177_v57 = vsel %vm167_vm2, %v174_v47, %v176_v34  ;;  %v532_v44 = vld [vmem:[#allocation2 + $0x4d8] sm:$0xff] }
  0x9d   :  { %v149_v51 = vadd.f32 %v140_v45, %v106_v48  ;;  %v150_v52 = vadd.f32 %v142_v50, %v107_v41  ;;  %v210_v55 = vmax.f32 %v182_v35, %v206_v49  ;;  %v211_v58 = vmax.f32 %v183_v29, %v207_v40  ;;  %v534_v48 = vld [vmem:[#allocation2 + $0x4e8] sm:$0xff]  ;;  %v533_v49 = vld [vmem:[#allocation2 + $0x4e0] sm:$0xff]  ;;  %v531_v45 = vld [vmem:[#allocation2 + $0x4d0] sm:$0xff] }
  0x9e   :  { %v530_v50 = vld [vmem:[#allocation2 + $0x4c8] sm:$0xff] }
  0x9f   :  { %v184_v60 = vadd.f32 %v175_v56, %v149_v51  ;;  %v185_v61 = vadd.f32 %v177_v57, %v150_v52  ;;  %v218_v54 = vrot.slane %v210_v55, 6  ;;  %v219_v62 = vrot.slane %v211_v58, 6  ;;  %v529_v51 = vld [vmem:[#allocation2 + $0x4c0] sm:$0xff]  ;;  %v528_v52 = vld [vmem:[#allocation2 + $0x4b8] sm:$0xff] }
  0xa0   :  { %v437_v55 = vld [vmem:[#allocation2 + $0x1e0] sm:$0xff]  ;;  %v436_v57 = vld [vmem:[#allocation2 + $0x1d8] sm:$0xff] }
  0xa1   :  { %v208_v63 = vmul.f32 0.2, %v184_v60  ;;  %v228_v0 = vsel %vm63_vm0, 0.0, %v218_v54  ;;  %v209_v1 = vmul.f32 0.2, %v185_v61  ;;  %v220_v2 = vsel %vm63_vm0, %v218_v54, %v219_v62  ;;  %v421_v56 = vld [vmem:[#allocation2 + $0x160] sm:$0xff]  ;;  %2529 = vmatprep.subr.mxu1 %v437_v55 }
  0xa2   :  { %v254_v3 = vrot.slane %v228_v0, 2  ;;  %v235_v4 = vrot.slane %v219_v62, 1  ;;  %v232_v5 = vrot.slane %v228_v0, 1  ;;  %v255_v6 = vrot.slane %v220_v2, 2  ;;  %v420_v58 = vld [vmem:[#allocation2 + $0x158] sm:$0xff]  ;;  %2530 = vmatpush3.msra.mxu1 %v421_v56  ;;  %v434_v54 = vld [vmem:[#allocation2 + $0x1c8] sm:$0xff] }
  0xa3   :  { %v233_v7 = vrot.slane %v220_v2, 1  ;;  %v212_v8 = vmax.f32 %v184_v60, %v208_v63  ;;  %v213_v9 = vmax.f32 %v185_v61, %v209_v1  ;;  %v257_v11 = vrot.slane %v219_v62, 2  ;;  %v435_v60 = vld [vmem:[#allocation2 + $0x1d0] sm:$0xff]  ;;  %2531 = vmatprep.subr.mxu1 %v436_v57  ;;  %v418_v62 = vld [vmem:[#allocation2 + $0x148] sm:$0xff]  ;;  %v433_v63 = vld [vmem:[#allocation2 + $0x1c0] sm:$0xff] }
  0xa4   :  { %v256_v12 = vsel %vm167_vm2, %v254_v3, %v255_v6  ;;  %v419_v61 = vld [vmem:[#allocation2 + $0x150] sm:$0xff]  ;;  %2532 = vmatpush3.msra.mxu1 %v420_v58  ;;  %v432_v1 = vld [vmem:[#allocation2 + $0x1b8] sm:$0xff] }
  0xa5   :  { %v236_v13 = vsel %vm132_vm1, %v233_v7, %v235_v4  ;;  %v234_v15 = vsel %vm132_vm1, %v232_v5, %v233_v7  ;;  %v221_v16 = vrot.slane %v212_v8, 6  ;;  %2466 = vmatprep.mubr.msk.f32.mxu0 %vm264_vm3, %v256_v12  ;;  %v222_v17 = vrot.slane %v213_v9, 6  ;;  %2533 = vmatprep.subr.mxu1 %v435_v60  ;;  %v431_v3 = vld [vmem:[#allocation2 + $0x1b0] sm:$0xff]  ;;  %v430_v5 = vld [vmem:[#allocation2 + $0x1a8] sm:$0xff]  ;;  %v429_v7 = vld [vmem:[#allocation2 + $0x1a0] sm:$0xff] }
  0xa6   :  { %244 = vrot.lane.b32.xlu1 %v236_v13, %s3220_s0  ;;  %v258_v18 = vsel %vm167_vm2, %v255_v6, %v257_v11  ;;  %242 = vrot.lane.b32.xlu0 %v234_v15, %s3220_s0  ;;  %v415_v4 = vld [vmem:[#allocation2 + $0x130] sm:$0xff]  ;;  %v414_v6 = vld [vmem:[#allocation2 + $0x128] sm:$0xff]  ;;  %v413_v8 = vld [vmem:[#allocation2 + $0x120] sm:$0xff] }
  0xa7   :  { %v229_v19 = vsel %vm63_vm0, 0.0, %v221_v16  ;;  %v223_v22 = vsel %vm63_vm0, %v221_v16, %v222_v17  ;;  %v240_v23 = vrot.slane %v222_v17, 1  ;;  %v262_v36 = vrot.slane %v222_v17, 2  ;;  %2534 = vmatpush3.msra.mxu1 %v419_v61  ;;  %v428_v9 = vld [vmem:[#allocation2 + $0x198] sm:$0xff]  ;;  %v427_v12 = vld [vmem:[#allocation2 + $0x190] sm:$0xff]  ;;  %v426_v15 = vld [vmem:[#allocation2 + $0x188] sm:$0xff] }
  0xa8   :  { %v237_v24 = vrot.slane %v229_v19, 1  ;;  %v238_v25 = vrot.slane %v223_v22, 1  ;;  %v259_v31 = vrot.slane %v229_v19, 2  ;;  %v260_v32 = vrot.slane %v223_v22, 2  ;;  %2535 = vmatprep.subr.mxu1 %v434_v54  ;;  %v412_v11 = vld [vmem:[#allocation2 + $0x118] sm:$0xff]  ;;  %v411_v13 = vld [vmem:[#allocation2 + $0x110] sm:$0xff] }
  0xa9   :  { %2536 = vmatpush3.msra.mxu1 %v418_v62  ;;  %v410_v16 = vld [vmem:[#allocation2 + $0x108] sm:$0xff]  ;;  %v425_v17 = vld [vmem:[#allocation2 + $0x180] sm:$0xff] }
  0xaa   :  { %v241_v26 = vsel %vm132_vm1, %v238_v25, %v240_v23  ;;  %v239_v27 = vsel %vm132_vm1, %v237_v24, %v238_v25  ;;  %v261_v35 = vsel %vm167_vm2, %v259_v31, %v260_v32  ;;  %v263_v42 = vsel %vm167_vm2, %v260_v32, %v262_v36  ;;  %2537 = vmatprep.subr.mxu1 %v433_v63  ;;  %v407_v23 = vld [vmem:[#allocation2 + $0xf0] sm:$0xff]  ;;  %v3351_v32 = vld [vmem:[#allocation2 + $0x220] sm:$0xff] }
  0xab   :  { %248 = vrot.lane.b32.xlu1 %v241_v26, %s3220_s0  ;;  %246 = vrot.lane.b32.xlu0 %v239_v27, %s3220_s0  ;;  %v2470_v24 = vld [vmem:[#allocation2 + $0xd0] ss:$0 sm:$0xff]  ;;  %v422_v27 = vld [vmem:[#allocation2 + $0x168] sm:$0xff] }
 0x118   :  { %v243_v28 = vpop.permute.xlu0 %242  ;;  %v245_v30 = vpop.permute.xlu1 %244 }
 0x119   :  { %v265_v29 = vsel %vm264_vm3, %v228_v0, %v243_v28  ;;  %v266_v33 = vsel %vm264_vm3, %v220_v2, %v245_v30  ;;  %v417_v0 = vld [vmem:[#allocation2 + $0x140] sm:$0xff]  ;;  %v416_v2 = vld [vmem:[#allocation2 + $0x138] sm:$0xff]  ;;  %v406_v28 = vld [vmem:[#allocation2 + $0xe8] sm:$0xff] }
 0x11a   :  { %342 = vmatmul.mubr.f32.vlgmr.msra.gmra.mxu0 %v265_v29  ;;  %2538 = vmatpush3.msra.mxu1 %v417_v0  ;;  %v194_v29 = vmul.f32 %v3287_v46, %v3307_v20 }
 0x11b   :  { %2467 = vmatprep.mubr.msk.f32.mxu0 %vm264_vm3, %v258_v18  ;;  %2940 = vmatpush3.msra.mxu0 %v535_v21  ;;  %v409_v18 = vld [vmem:[#allocation2 + $0x100] sm:$0xff]  ;;  %v408_v21 = vld [vmem:[#allocation2 + $0xf8] sm:$0xff] }
 0x11c   :  { %2941 = vmatprep.subr.mxu0 %v534_v48  ;;  %2539 = vmatprep.subr.mxu1 %v432_v1 }
 0x11d   :  { %v247_v34 = vpop.permute.xlu0 %246  ;;  %v249_v41 = vpop.permute.xlu1 %248  ;;  %2942 = vmatpush3.msra.mxu0 %v534_v48  ;;  %2540 = vmatpush3.msra.mxu1 %v416_v2 }
 0x11e   :  { %347 = vmatmul.mubr.f32.gmra.mxu0 %v266_v33  ;;  %v267_v40 = vsel %vm264_vm3, %v229_v19, %v247_v34  ;;  %v268_v47 = vsel %vm264_vm3, %v223_v22, %v249_v41  ;;  %2943 = vmatprep.subr.mxu0 %v533_v49  ;;  %v424_v19 = vld [vmem:[#allocation2 + $0x178] sm:$0xff]  ;;  %v423_v22 = vld [vmem:[#allocation2 + $0x170] sm:$0xff]  ;;  %v193_v33 = vmul.f32 %v3287_v46, %v3294_v59 }
 0x11f   :  { %2468 = vmatprep.mubr.msk.f32.mxu0 %vm264_vm3, %v261_v35  ;;  %2944 = vmatpush3.msra.mxu0 %v533_v49  ;;  %v204_v41 = vadd.f32 %v3290_v53, %v194_v29 }
 0x120   :  { %2945 = vmatprep.subr.mxu0 %v532_v44  ;;  %2541 = vmatprep.subr.mxu1 %v431_v3  ;;  %v203_v48 = vadd.f32 %v3290_v53, %v193_v33 }
 0x121   :  { %2946 = vmatpush3.msra.mxu0 %v532_v44  ;;  %2542 = vmatpush3.msra.mxu1 %v415_v4 }
 0x122   :  { %352 = vmatmul.mubr.f32.gmra.mxu0 %v267_v40  ;;  %2947 = vmatprep.subr.mxu0 %v531_v45  ;;  %v195_v40 = vmul.f32 %v3287_v46, %v3298_v10  ;;  %v3368_v10 = vrot.slane %v3219_v14, 2  ;;  %v389_v58 = vrot.slane %v203_v48, 2 }
 0x123   :  { %2469 = vmatprep.mubr.msk.f32.mxu0 %vm264_vm3, %v263_v42  ;;  %2948 = vmatpush3.msra.mxu0 %v531_v45 }
 0x124   :  { %2949 = vmatprep.subr.mxu0 %v530_v50  ;;  %2543 = vmatprep.subr.mxu1 %v430_v5 }
 0x125   :  { %2950 = vmatpush3.msra.mxu0 %v530_v50  ;;  %2544 = vmatpush3.msra.mxu1 %v414_v6  ;;  %v3364_v50 = vrot.slane %v3219_v14, 6 }
 0x126   :  { %357 = vmatmul.mubr.f32.gmra.mxu0 %v268_v47  ;;  %2951 = vmatprep.subr.mxu0 %v529_v51 }
 0x127   :  { %2952 = vmatpush3.msra.mxu0 %v529_v51  ;;  %2545 = vmatprep.subr.mxu1 %v429_v7  ;;  %v205_v51 = vadd.f32 %v3290_v53, %v195_v40 }
 0x128   :  { %2953 = vmatprep.subr.mxu0 %v528_v52  ;;  %2546 = vmatpush3.msra.mxu1 %v413_v8 }
 0x129   :  { %2954 = vmatpush3.msra.mxu0 %v528_v52  ;;  %2547 = vmatprep.subr.mxu1 %v428_v9  ;;  %v390_v52 = vrot.slane %v204_v41, 2  ;;  %v392_v63 = vrot.slane %v205_v51, 2 }
 0x12a   :  { %2548 = vmatpush3.msra.mxu1 %v412_v11 }
 0x12b   :  { %2549 = vmatprep.subr.mxu1 %v427_v12  ;;  %v393_v11 = vsel %vm167_vm2, %v390_v52, %v392_v63 }
 0x12c   :  { %2550 = vmatpush3.msra.mxu1 %v411_v13 }
 0x12d   :  { %2551 = vmatprep.subr.mxu1 %v426_v15 }
 0x12e   :  { %2552 = vmatpush3.msra.mxu1 %v410_v16 }
 0x12f   :  { %2553 = vmatprep.subr.mxu1 %v425_v17 }
 0x130   :  { %2554 = vmatpush3.msra.mxu1 %v409_v18 }
 0x131   :  { %2555 = vmatprep.subr.mxu1 %v424_v19 }
 0x132   :  { %2556 = vmatpush3.msra.mxu1 %v408_v21 }
 0x133   :  { %2557 = vmatprep.subr.mxu1 %v423_v22 }
 0x134   :  { %2558 = vmatpush3.msra.mxu1 %v407_v23 }
 0x135   :  { %2559 = vmatprep.subr.mxu1 %v422_v27 }
 0x136   :  { %2560 = vmatpush3.msra.mxu1 %v406_v28 }
 0x137   :  { %2917 = vmatprep.subr.mxu1 %v3351_v32 }
 0x1da   :  { %v343_v25 = vpop.f32.mrf.mxu0 }
 0x1db   :  { %v366_v26 = vadd.f32 %v2470_v24, %v343_v25 }
 0x1dc   :  { %v345_v30 = vpop.f32.mrf.mxu0 }
 0x1dd   :  { %v370_v31 = vmul.f32 0.2, %v366_v26  ;;  %v1999_v30 = vld [vmem:[#allocation2 + $0xa58] sm:$0xff] }
 0x1de   :  { %v348_v34 = vpop.f32.mrf.mxu0 }
 0x1df   :  { %v374_v35 = vmax.f32 %v366_v26, %v370_v31  ;;  %v367_v36 = vadd.f32 %v2470_v24, %v348_v34  ;;  %v3414_v26 = vrot.slane %v3219_v14, 4  ;;  %v444_v34 = vld [vmem:[#allocation2 + $0x218] sm:$0xff] }
 0x1e0   :  { %v350_v20 = vpop.f32.mrf.mxu0 }
 0x1e1   :  { %v398_v42 = vadd.f32 %v3316_v39, %v374_v35  ;;  %v371_v47 = vmul.f32 0.2, %v367_v36  ;;  %v443_v35 = vld [vmem:[#allocation2 + $0x210] sm:$0xff]  ;;  %v442_v20 = vld [vmem:[#allocation2 + $0x208] sm:$0xff] }
 0x1e2   :  { %v353_v49 = vpop.f32.mrf.mxu0 }
 0x1e3   :  { %v3361_v44 = vmax.f32 %v398_v42, 0.0  ;;  %v375_v59 = vmax.f32 %v367_v36, %v371_v47  ;;  %v368_v45 = vadd.f32 %v2470_v24, %v353_v49 }
 0x1e4   :  { %v355_v46 = vpop.f32.mrf.mxu0 }
 0x1e5   :  { %v399_v39 = vadd.f32 %v3319_v43, %v375_v59  ;;  %v372_v55 = vmul.f32 0.2, %v368_v45  ;;  %2955 = vmatprep.mubr.msk.f32.mxu0 %vm264_vm3, %v3361_v44  ;;  %v578_v56 = vrot.slane %v3361_v44, 6  ;;  %v543_v57 = vrot.slane %v3361_v44, 2  ;;  %v441_v59 = vld [vmem:[#allocation2 + $0x200] sm:$0xff] }
 0x1e6   :  { %v358_v60 = vpop.f32.mrf.mxu0  ;;  %v391_v43 = vsel %vm167_vm2, %v389_v58, %v390_v52  ;;  %v565_v27 = vrot.slane %v3361_v44, 4  ;;  %v440_v52 = vld [vmem:[#allocation2 + $0x1f8] sm:$0xff]  ;;  %v438_v58 = vld [vmem:[#allocation2 + $0x1e8] sm:$0xff] }
 0x1e7   :  { %v3375_v61 = vmax.f32 %v399_v39, 0.0  ;;  %v376_v53 = vmax.f32 %v368_v45, %v372_v55  ;;  %v369_v54 = vadd.f32 %v2470_v24, %v358_v60  ;;  %v579_v62 = vsel %vm63_vm0, %v3364_v50, %v578_v56  ;;  %v439_v55 = vld [vmem:[#allocation2 + $0x1f0] sm:$0xff] }
 0x1e8   :  { %586 = vrot.lane.b32.xlu0 %v579_v62, %s3220_s0  ;;  %v544_v0 = vsel %vm167_vm2, %v3368_v10, %v543_v57  ;;  %v360_v1 = vpop.f32.mrf.mxu0  ;;  %v566_v29 = vsel %vm563_vm4, %v3414_v26, %v565_v27 }
 0x1e9   :  { %v400_v2 = vadd.f32 %v391_v43, %v376_v53  ;;  %v373_v3 = vmul.f32 0.2, %v369_v54  ;;  %551 = vrot.lane.b32.xlu1 %v544_v0, %s3220_s0  ;;  %2956 = vmatmul.mubr.msk.f32.vlgmr.msra.gmra.mxu0 %vm264_vm3, %v3375_v61  ;;  %v545_v4 = vrot.slane %v3375_v61, 2  ;;  %v580_v5 = vrot.slane %v3375_v61, 6  ;;  %v478_v43 = vld [vmem:[#allocation2 + $0x328] sm:$0xff] }
 0x1ea   :  { %v567_v36 = vrot.slane %v3375_v61, 4  ;;  %v462_v0 = vld [vmem:[#allocation2 + $0x2a8] sm:$0xff] }
 0x1eb   :  { %v3388_v6 = vmax.f32 %v400_v2, 0.0  ;;  %v377_v7 = vmax.f32 %v369_v54, %v373_v3  ;;  %v546_v8 = vsel %vm167_vm2, %v543_v57, %v545_v4  ;;  %v581_v9 = vsel %vm63_vm0, %v578_v56, %v580_v5  ;;  %v510_v1 = vld [vmem:[#allocation2 + $0x428] sm:$0xff]  ;;  %v477_v2 = vld [vmem:[#allocation2 + $0x320] sm:$0xff]  ;;  %v476_v5 = vld [vmem:[#allocation2 + $0x318] sm:$0xff] }
 0x1ec   :  { %v3161_v12 = vpack.i.bf16 %v546_v8, %v581_v9  ;;  %v568_v49 = vsel %vm563_vm4, %v565_v27, %v567_v36  ;;  %2641 = vmatprep.subr.mxu0 %v510_v1  ;;  %v494_v3 = vld [vmem:[#allocation2 + $0x3a8] sm:$0xff]  ;;  %v461_v4 = vld [vmem:[#allocation2 + $0x2a0] sm:$0xff]  ;;  %v475_v8 = vld [vmem:[#allocation2 + $0x310] sm:$0xff] }
 0x1ed   :  { %v401_v13 = vadd.f32 %v393_v11, %v377_v7  ;;  %2958 = vmatprep.mubr.msk.f32.mxu0 %vm264_vm3, %v3388_v6  ;;  %v582_v15 = vrot.slane %v3388_v6, 6  ;;  %v547_v16 = vrot.slane %v3388_v6, 2  ;;  %v569_v41 = vrot.slane %v3388_v6, 4  ;;  %2642 = vmatpush3.msra.mxu0 %v494_v3  ;;  %v493_v7 = vld [vmem:[#allocation2 + $0x3a0] sm:$0xff]  ;;  %v492_v9 = vld [vmem:[#allocation2 + $0x398] sm:$0xff]  ;;  %v459_v11 = vld [vmem:[#allocation2 + $0x290] sm:$0xff] }
 0x1ee   :  { %3162 = vrot.lane.b32.xlu0 %v3161_v12, %s3220_s0  ;;  %v507_v12 = vld [vmem:[#allocation2 + $0x410] sm:$0xff]  ;;  %v504_v27 = vld [vmem:[#allocation2 + $0x3f8] sm:$0xff]  ;;  %v454_v36 = vld [vmem:[#allocation2 + $0x268] sm:$0xff] }
 0x1ef   :  { %v3398_v17 = vmax.f32 %v401_v13, 0.0  ;;  %v583_v18 = vsel %vm63_vm0, %v3364_v50, %v582_v15  ;;  %v548_v19 = vsel %vm167_vm2, %v3368_v10, %v547_v16  ;;  %v570_v51 = vsel %vm563_vm4, %v3414_v26, %v569_v41  ;;  %v474_v13 = vld [vmem:[#allocation2 + $0x308] sm:$0xff]  ;;  %v463_v1 = vld [vmem:[#allocation2 + $0x2b0] sm:$0xff] }
 0x1f0   :  { %590 = vrot.lane.b32.xlu1 %v583_v18, %s3220_s0  ;;  %v473_v18 = vld [vmem:[#allocation2 + $0x300] sm:$0xff]  ;;  %v447_v3 = vld [vmem:[#allocation2 + $0x230] sm:$0xff] }
 0x1f1   :  { %2959 = vmatmul.mubr.msk.f32.gmra.mxu0 %vm264_vm3, %v3398_v17  ;;  %v549_v21 = vrot.slane %v3398_v17, 2  ;;  %v584_v22 = vrot.slane %v3398_v17, 6  ;;  %v571_v39 = vrot.slane %v3398_v17, 4 }
 0x1f2   :  { %555 = vrot.lane.b32.xlu0 %v548_v19, %s3220_s0  ;;  %v490_v19 = vld [vmem:[#allocation2 + $0x388] sm:$0xff] }
 0x1f3   :  { %v550_v23 = vsel %vm167_vm2, %v547_v16, %v549_v21  ;;  %v585_v24 = vsel %vm63_vm0, %v582_v15, %v584_v22  ;;  %v572_v54 = vsel %vm563_vm4, %v569_v41, %v571_v39  ;;  %v491_v15 = vld [vmem:[#allocation2 + $0x390] sm:$0xff]  ;;  %v458_v16 = vld [vmem:[#allocation2 + $0x288] sm:$0xff]  ;;  %v457_v21 = vld [vmem:[#allocation2 + $0x280] sm:$0xff] }
 0x1f4   :  { %v3166_v25 = vpack.i.bf16 %v550_v23, %v585_v24  ;;  %v505_v22 = vld [vmem:[#allocation2 + $0x400] sm:$0xff]  ;;  %v472_v23 = vld [vmem:[#allocation2 + $0x2f8] sm:$0xff]  ;;  %v466_v39 = vld [vmem:[#allocation2 + $0x2c8] sm:$0xff] }
 0x1f5   :  { %v489_v24 = vld [vmem:[#allocation2 + $0x380] sm:$0xff] }
 0x1f6   :  { %3167 = vrot.lane.b32.xlu1 %v3166_v25, %s3220_s0  ;;  %v456_v25 = vld [vmem:[#allocation2 + $0x278] sm:$0xff]  ;;  %v469_v41 = vld [vmem:[#allocation2 + $0x2e0] sm:$0xff] }
 0x1fa   :  { %1739 = vrot.lane.b32.xlu1 %v3414_v26, %s3220_s0 }
 0x25a   :  { %v587_v28 = vpop.permute.xlu0 %586 }
 0x25b   :  { %v602_v31 = vsel %vm264_vm3, %v566_v29, %v587_v28  ;;  %v552_v33 = vpop.permute.xlu1 %551  ;;  %v471_v28 = vld [vmem:[#allocation2 + $0x2f0] sm:$0xff]  ;;  %v488_v29 = vld [vmem:[#allocation2 + $0x378] sm:$0xff] }
 0x25c   :  { %678 = vmatprep.mubr.f32.mxu1 %v602_v31  ;;  %v455_v31 = vld [vmem:[#allocation2 + $0x270] sm:$0xff] }
 0x25d   :  { %2472 = vmatmul.mubr.msk.f32.vlgmr.msra.gmra.mxu1 %vm3422_vm5, %v552_v33  ;;  %v503_v33 = vld [vmem:[#allocation2 + $0x3f0] sm:$0xff] }
 0x25e   :  { %2918 = vmatpush3.msra.mxu1 %v3351_v32 }
 0x25f   :  { %2919 = vmatprep.subr.mxu1 %v444_v34 }
 0x260   :  { %v3163_v40 = vpop.permute.xlu0 %3162  ;;  %2920 = vmatpush3.msra.mxu1 %v444_v34  ;;  %v470_v34 = vld [vmem:[#allocation2 + $0x2e8] sm:$0xff] }
 0x261   :  { %v3165_v42 = vunpack.i.h.bf16 %v3163_v40  ;;  %v3164_v47 = vunpack.i.l.bf16 %v3163_v40  ;;  %2921 = vmatprep.subr.mxu1 %v443_v35  ;;  %v502_v40 = vld [vmem:[#allocation2 + $0x3e8] sm:$0xff] }
 0x262   :  { %v591_v48 = vpop.permute.xlu1 %590  ;;  %2922 = vmatpush3.msra.mxu1 %v443_v35  ;;  %v487_v35 = vld [vmem:[#allocation2 + $0x370] sm:$0xff] }
 0x263   :  { %v603_v45 = vsel %vm264_vm3, %v568_v49, %v3164_v47  ;;  %v599_v32 = vsel %vm264_vm3, %v3361_v44, %v3165_v42  ;;  %2923 = vmatprep.subr.mxu1 %v442_v20  ;;  %v604_v46 = vsel %vm264_vm3, %v570_v51, %v591_v48  ;;  %v453_v42 = vld [vmem:[#allocation2 + $0x260] sm:$0xff]  ;;  %v468_v48 = vld [vmem:[#allocation2 + $0x2d8] sm:$0xff] }
 0x264   :  { %683 = vmatprep.mubr.f32.mxu1 %v603_v45  ;;  %2924 = vmatpush3.msra.mxu1 %v442_v20  ;;  %v556_v56 = vpop.permute.xlu0 %555  ;;  %v486_v20 = vld [vmem:[#allocation2 + $0x368] sm:$0xff]  ;;  %v501_v47 = vld [vmem:[#allocation2 + $0x3e0] sm:$0xff]  ;;  %v500_v45 = vld [vmem:[#allocation2 + $0x3d8] sm:$0xff] }
 0x265   :  { %684 = vmatmul.mubr.f32.gmra.mxu1 %v599_v32  ;;  %2925 = vmatprep.subr.mxu1 %v441_v59  ;;  %v485_v49 = vld [vmem:[#allocation2 + $0x360] sm:$0xff]  ;;  %v467_v32 = vld [vmem:[#allocation2 + $0x2d0] sm:$0xff]  ;;  %v484_v51 = vld [vmem:[#allocation2 + $0x358] sm:$0xff] }
 0x266   :  { %688 = vmatprep.mubr.f32.mxu1 %v604_v46  ;;  %2926 = vmatpush3.msra.mxu1 %v441_v59  ;;  %v452_v59 = vld [vmem:[#allocation2 + $0x258] sm:$0xff]  ;;  %v499_v46 = vld [vmem:[#allocation2 + $0x3d0] sm:$0xff] }
 0x267   :  { %2927 = vmatprep.subr.mxu1 %v440_v52 }
 0x268   :  { %v3168_v57 = vpop.permute.xlu1 %3167  ;;  %2928 = vmatpush3.msra.mxu1 %v440_v52  ;;  %v451_v52 = vld [vmem:[#allocation2 + $0x250] sm:$0xff] }
 0x269   :  { %v3170_v60 = vunpack.i.h.bf16 %v3168_v57  ;;  %v3169_v53 = vunpack.i.l.bf16 %v3168_v57  ;;  %2474 = vmatmul.mubr.msk.f32.gmra.mxu1 %vm3422_vm5, %v556_v56  ;;  %2929 = vmatprep.subr.mxu1 %v439_v55  ;;  %v450_v56 = vld [vmem:[#allocation2 + $0x248] sm:$0xff] }
 0x26a   :  { %2930 = vmatpush3.msra.mxu1 %v439_v55  ;;  %v483_v55 = vld [vmem:[#allocation2 + $0x350] sm:$0xff]  ;;  %v498_v57 = vld [vmem:[#allocation2 + $0x3c8] sm:$0xff] }
 0x26b   :  { %v605_v62 = vsel %vm264_vm3, %v572_v54, %v3169_v53  ;;  %v601_v63 = vsel %vm264_vm3, %v3388_v6, %v3170_v60  ;;  %2931 = vmatprep.subr.mxu1 %v438_v58  ;;  %v482_v60 = vld [vmem:[#allocation2 + $0x348] sm:$0xff]  ;;  %v449_v53 = vld [vmem:[#allocation2 + $0x240] sm:$0xff] }
 0x26c   :  { %693 = vmatprep.mubr.f32.mxu1 %v605_v62  ;;  %2932 = vmatpush3.msra.mxu1 %v438_v58  ;;  %v465_v58 = vld [vmem:[#allocation2 + $0x2c0] sm:$0xff]  ;;  %v464_v62 = vld [vmem:[#allocation2 + $0x2b8] sm:$0xff] }
 0x26d   :  { %694 = vmatmul.mubr.f32.gmra.mxu1 %v601_v63  ;;  %2597 = vmatprep.subr.mxu1 %v478_v43  ;;  %v497_v54 = vld [vmem:[#allocation2 + $0x3c0] sm:$0xff]  ;;  %v448_v43 = vld [vmem:[#allocation2 + $0x238] sm:$0xff] }
 0x26e   :  { %2933 = vmatprep.mubr.msk.f32.mxu1 %vm264_vm3, %v3361_v44  ;;  %v509_v44 = vld [vmem:[#allocation2 + $0x420] sm:$0xff] }
 0x26f   :  { %2643 = vmatprep.subr.mxu0 %v509_v44  ;;  %v481_v63 = vld [vmem:[#allocation2 + $0x340] sm:$0xff]  ;;  %v479_v44 = vld [vmem:[#allocation2 + $0x330] sm:$0xff] }
 0x270   :  { %2644 = vmatpush3.msra.mxu0 %v493_v7  ;;  %v1243_v7 = vld [vmem:[#allocation2 + $0x5f8] sm:$0xff] }
 0x271   :  { %2934 = vmatmul.mubr.msk.f32.vlgmr.msra.gmra.mxu1 %vm264_vm3, %v3375_v61  ;;  %v460_v61 = vld [vmem:[#allocation2 + $0x298] sm:$0xff] }
 0x272   :  { %2936 = vmatprep.mubr.msk.f32.mxu1 %vm264_vm3, %v3388_v6  ;;  %2598 = vmatpush3.msra.mxu1 %v462_v0  ;;  %v508_v6 = vld [vmem:[#allocation2 + $0x418] sm:$0xff] }
 0x273   :  { %2599 = vmatprep.subr.mxu1 %v477_v2  ;;  %2645 = vmatprep.subr.mxu0 %v508_v6  ;;  %v496_v0 = vld [vmem:[#allocation2 + $0x3b8] sm:$0xff] }
 0x274   :  { %2600 = vmatpush3.msra.mxu1 %v461_v4  ;;  %2646 = vmatpush3.msra.mxu0 %v492_v9  ;;  %v480_v2 = vld [vmem:[#allocation2 + $0x338] sm:$0xff]  ;;  %v495_v4 = vld [vmem:[#allocation2 + $0x3b0] sm:$0xff] }
 0x275   :  { %2937 = vmatmul.mubr.msk.f32.gmra.mxu1 %vm264_vm3, %v3398_v17  ;;  %2601 = vmatprep.subr.mxu1 %v476_v5  ;;  %v506_v17 = vld [vmem:[#allocation2 + $0x408] sm:$0xff] }
 0x276   :  { %2602 = vmatpush3.msra.mxu1 %v460_v61  ;;  %2647 = vmatprep.subr.mxu0 %v507_v12  ;;  %v526_v5 = vld [vmem:[#allocation2 + $0x4a8] sm:$0xff] }
 0x277   :  { %2603 = vmatprep.subr.mxu1 %v475_v8  ;;  %2648 = vmatpush3.msra.mxu0 %v491_v15 }
 0x278   :  { %2604 = vmatpush3.msra.mxu1 %v459_v11  ;;  %2649 = vmatprep.subr.mxu0 %v506_v17  ;;  %v2479_v17 = vld [vmem:[#allocation2 + $0x228] ss:$0 sm:$0xff] }
 0x279   :  { %2605 = vmatprep.subr.mxu1 %v474_v13  ;;  %2650 = vmatpush3.msra.mxu0 %v490_v19 }
 0x27a   :  { %2606 = vmatpush3.msra.mxu1 %v458_v16  ;;  %2651 = vmatprep.subr.mxu0 %v505_v22 }
 0x27b   :  { %2607 = vmatprep.subr.mxu1 %v473_v18  ;;  %2652 = vmatpush3.msra.mxu0 %v489_v24 }
 0x27c   :  { %2608 = vmatpush3.msra.mxu1 %v457_v21  ;;  %2653 = vmatprep.subr.mxu0 %v504_v27 }
 0x27d   :  { %2609 = vmatprep.subr.mxu1 %v472_v23  ;;  %2654 = vmatpush3.msra.mxu0 %v488_v29 }
 0x27e   :  { %2610 = vmatpush3.msra.mxu1 %v456_v25  ;;  %2655 = vmatprep.subr.mxu0 %v503_v33 }
 0x27f   :  { %2611 = vmatprep.subr.mxu1 %v471_v28  ;;  %2656 = vmatpush3.msra.mxu0 %v487_v35 }
 0x280   :  { %2612 = vmatpush3.msra.mxu1 %v455_v31  ;;  %2657 = vmatprep.subr.mxu0 %v502_v40 }
 0x281   :  { %2613 = vmatprep.subr.mxu1 %v470_v34  ;;  %2658 = vmatpush3.msra.mxu0 %v486_v20 }
 0x282   :  { %2614 = vmatpush3.msra.mxu1 %v454_v36  ;;  %2659 = vmatprep.subr.mxu0 %v501_v47 }
 0x283   :  { %2615 = vmatprep.subr.mxu1 %v469_v41  ;;  %2660 = vmatpush3.msra.mxu0 %v485_v49 }
 0x284   :  { %2616 = vmatpush3.msra.mxu1 %v453_v42  ;;  %2661 = vmatprep.subr.mxu0 %v500_v45 }
 0x285   :  { %2617 = vmatprep.subr.mxu1 %v468_v48  ;;  %2662 = vmatpush3.msra.mxu0 %v484_v51 }
 0x286   :  { %2618 = vmatpush3.msra.mxu1 %v452_v59  ;;  %2663 = vmatprep.subr.mxu0 %v499_v46 }
 0x287   :  { %2619 = vmatprep.subr.mxu1 %v467_v32  ;;  %2664 = vmatpush3.msra.mxu0 %v483_v55  ;;  %v525_v55 = vld [vmem:[#allocation2 + $0x4a0] sm:$0xff] }
 0x288   :  { %2620 = vmatpush3.msra.mxu1 %v451_v52  ;;  %2665 = vmatprep.subr.mxu0 %v498_v57 }
 0x289   :  { %2621 = vmatprep.subr.mxu1 %v466_v39  ;;  %2666 = vmatpush3.msra.mxu0 %v482_v60 }
 0x28a   :  { %2622 = vmatpush3.msra.mxu1 %v450_v56  ;;  %2667 = vmatprep.subr.mxu0 %v497_v54 }
 0x28b   :  { %2623 = vmatprep.subr.mxu1 %v465_v58  ;;  %2668 = vmatpush3.msra.mxu0 %v481_v63  ;;  %v1227_v58 = vld [vmem:[#allocation2 + $0x578] sm:$0xff] }
 0x28c   :  { %2624 = vmatpush3.msra.mxu1 %v449_v53  ;;  %2669 = vmatprep.subr.mxu0 %v496_v0  ;;  %v524_v53 = vld [vmem:[#allocation2 + $0x498] sm:$0xff] }
 0x28d   :  { %2625 = vmatprep.subr.mxu1 %v464_v62  ;;  %2670 = vmatpush3.msra.mxu0 %v480_v2  ;;  %v1242_v2 = vld [vmem:[#allocation2 + $0x5f0] sm:$0xff] }
 0x28e   :  { %2626 = vmatpush3.msra.mxu1 %v448_v43  ;;  %2671 = vmatprep.subr.mxu0 %v495_v4 }
 0x28f   :  { %2627 = vmatprep.subr.mxu1 %v463_v1  ;;  %2672 = vmatpush3.msra.mxu0 %v479_v44  ;;  %v523_v1 = vld [vmem:[#allocation2 + $0x490] sm:$0xff] }
 0x290   :  { %2628 = vmatpush3.msra.mxu1 %v447_v3  ;;  %2705 = vmatprep.subr.mxu0 %v1243_v7 }
 0x291   :  { %2961 = vmatprep.subr.mxu1 %v526_v5 }
 0x31d   :  { %v2561_v61 = vpop.f32.mrf.mxu1 }
 0x31f   :  { %v2562_v6 = vpop.f32.mrf.mxu1 }
 0x320   :  { %v2563_v19 = vadd.f32 %v2562_v6, %v2561_v61  ;;  %v521_v6 = vld [vmem:[#allocation2 + $0x480] sm:$0xff] }
 0x325   :  { %v2564_v8 = vpop.f32.mrf.mxu1 }
 0x327   :  { %v2565_v9 = vpop.f32.mrf.mxu1 }
 0x328   :  { %v2566_v16 = vadd.f32 %v2565_v9, %v2564_v8  ;;  %v520_v9 = vld [vmem:[#allocation2 + $0x478] sm:$0xff] }
 0x329   :  { %v2567_v11 = vpop.f32.mrf.mxu1 }
 0x32b   :  { %v2568_v12 = vpop.f32.mrf.mxu1 }
 0x32c   :  { %v2569_v27 = vadd.f32 %v2568_v12, %v2567_v11  ;;  %v519_v12 = vld [vmem:[#allocation2 + $0x470] sm:$0xff] }
 0x32d   :  { %v2570_v13 = vpop.f32.mrf.mxu1 }
 0x32f   :  { %v2571_v15 = vpop.f32.mrf.mxu1 }
 0x330   :  { %v2572_v28 = vadd.f32 %v2571_v15, %v2570_v13  ;;  %v518_v15 = vld [vmem:[#allocation2 + $0x468] sm:$0xff] }
 0x331   :  { %v2935_v18 = vpop.f32.mrf.mxu1 }
 0x332   :  { %v771_v21 = vadd.f32 %v2935_v18, %v2566_v16  ;;  %v517_v16 = vld [vmem:[#allocation2 + $0x460] sm:$0xff]  ;;  %v515_v18 = vld [vmem:[#allocation2 + $0x450] sm:$0xff] }
 0x333   :  { %v765_v22 = vpop.f32.mrf.mxu1 }
 0x334   :  { %v789_v23 = vadd.f32 %v2479_v17, %v771_v21  ;;  %v766_v24 = vadd.f32 %v2563_v19, %v765_v22  ;;  %v514_v19 = vld [vmem:[#allocation2 + $0x448] sm:$0xff]  ;;  %v513_v21 = vld [vmem:[#allocation2 + $0x440] sm:$0xff]  ;;  %v512_v22 = vld [vmem:[#allocation2 + $0x438] sm:$0xff] }
 0x335   :  { %v2938_v25 = vpop.f32.mrf.mxu1 }
 0x336   :  { %v886_v29 = vmul.f32 0.2, %v789_v23  ;;  %v788_v31 = vadd.f32 %v2479_v17, %v766_v24  ;;  %v781_v35 = vadd.f32 %v2938_v25, %v2572_v28  ;;  %v1226_v24 = vld [vmem:[#allocation2 + $0x570] sm:$0xff]  ;;  %v1241_v25 = vld [vmem:[#allocation2 + $0x5e8] sm:$0xff]  ;;  %v1240_v28 = vld [vmem:[#allocation2 + $0x5e0] sm:$0xff] }
 0x337   :  { %v775_v33 = vpop.f32.mrf.mxu1 }
 0x338   :  { %v885_v34 = vmul.f32 0.2, %v788_v31  ;;  %v776_v36 = vadd.f32 %v2569_v27, %v775_v33  ;;  %v3454_v40 = vmax.f32 %v789_v23, %v886_v29  ;;  %v791_v42 = vadd.f32 %v2479_v17, %v781_v35  ;;  %v511_v23 = vld [vmem:[#allocation2 + $0x430] sm:$0xff]  ;;  %v1225_v27 = vld [vmem:[#allocation2 + $0x568] sm:$0xff]  ;;  %v1224_v29 = vld [vmem:[#allocation2 + $0x560] sm:$0xff] }
 0x339   :  { %v1223_v33 = vld [vmem:[#allocation2 + $0x558] sm:$0xff]  ;;  %v1222_v35 = vld [vmem:[#allocation2 + $0x550] sm:$0xff] }
 0x33a   :  { %v3456_v41 = vmax.f32 %v788_v31, %v885_v34  ;;  %v790_v20 = vadd.f32 %v2479_v17, %v776_v36  ;;  %v899_v52 = vrot.slane %v3454_v40, 2  ;;  %v923_v39 = vrot.slane %v3454_v40, 6  ;;  %v516_v17 = vld [vmem:[#allocation2 + $0x458] sm:$0xff]  ;;  %v1238_v34 = vld [vmem:[#allocation2 + $0x5d0] sm:$0xff]  ;;  %v1237_v36 = vld [vmem:[#allocation2 + $0x5c8] sm:$0xff] }
 0x33b   :  { %v888_v56 = vmul.f32 0.2, %v791_v42  ;;  %v911_v63 = vrot.slane %v3454_v40, 4  ;;  %v1239_v31 = vld [vmem:[#allocation2 + $0x5d8] sm:$0xff] }
 0x33c   :  { %v887_v47 = vmul.f32 0.2, %v790_v20  ;;  %v897_v48 = vrot.slane %v3456_v41, 2  ;;  %v921_v49 = vrot.slane %v3456_v41, 6  ;;  %v909_v59 = vrot.slane %v3456_v41, 4 }
 0x33d   :  { %v3477_v43 = vmax.f32 %v791_v42, %v888_v56  ;;  %v1235_v42 = vld [vmem:[#allocation2 + $0x5b8] sm:$0xff] }
 0x33e   :  { %v3461_v45 = vmax.f32 %v790_v20, %v887_v47  ;;  %v898_v32 = vsel %vm167_vm2, %v3368_v10, %v897_v48  ;;  %v922_v51 = vsel %vm63_vm0, %v3364_v50, %v921_v49  ;;  %v910_v46 = vsel %vm563_vm4, %v3414_v26, %v909_v59  ;;  %v1220_v20 = vld [vmem:[#allocation2 + $0x540] sm:$0xff]  ;;  %v1219_v47 = vld [vmem:[#allocation2 + $0x538] sm:$0xff] }
 0x33f   :  { %997 = vmatprep.mubr.f32.mxu1 %v898_v32  ;;  %1082 = vmatprep.mubr.f32.mxu0 %v922_v51  ;;  %v900_v57 = vsel %vm167_vm2, %v897_v48, %v899_v52  ;;  %v924_v60 = vsel %vm63_vm0, %v921_v49, %v923_v39  ;;  %v912_v0 = vsel %vm563_vm4, %v909_v59, %v911_v63  ;;  %v903_v7 = vrot.slane %v3477_v43, 2  ;;  %v1234_v48 = vld [vmem:[#allocation2 + $0x5b0] sm:$0xff]  ;;  %v1233_v59 = vld [vmem:[#allocation2 + $0x5a8] sm:$0xff]  ;;  %v1259_v51 = vld [vmem:[#allocation2 + $0x678] sm:$0xff] }
 0x340   :  { %998 = vmatmul.mubr.f32.vlgmr.msra.gmra.mxu1 %v3219_v14  ;;  %1083 = vmatmul.mubr.f32.vlgmr.msra.gmra.mxu0 %v910_v46  ;;  %v901_v54 = vrot.slane %v3461_v45, 2  ;;  %v925_v62 = vrot.slane %v3461_v45, 6  ;;  %v913_v44 = vrot.slane %v3461_v45, 4  ;;  %v927_v61 = vrot.slane %v3477_v43, 6  ;;  %v1218_v49 = vld [vmem:[#allocation2 + $0x530] sm:$0xff]  ;;  %v1217_v32 = vld [vmem:[#allocation2 + $0x528] sm:$0xff] }
 0x341   :  { %2962 = vmatpush3.msra.mxu1 %v526_v5  ;;  %1002 = vmatprep.mubr.f32.mxu1 %v900_v57  ;;  %v522_v5 = vld [vmem:[#allocation2 + $0x488] sm:$0xff]  ;;  %v915_v11 = vrot.slane %v3477_v43, 4  ;;  %v1232_v52 = vld [vmem:[#allocation2 + $0x5a0] sm:$0xff]  ;;  %v1274_v46 = vld [vmem:[#allocation2 + $0x6f0] sm:$0xff] }
 0x342   :  { %1087 = vmatprep.mubr.f32.mxu0 %v924_v60  ;;  %2963 = vmatprep.subr.mxu1 %v525_v55  ;;  %v902_v3 = vsel %vm167_vm2, %v3368_v10, %v901_v54  ;;  %v926_v4 = vsel %vm63_vm0, %v3364_v50, %v925_v62  ;;  %v914_v10 = vsel %vm563_vm4, %v3414_v26, %v913_v44  ;;  %v1216_v39 = vld [vmem:[#allocation2 + $0x520] sm:$0xff]  ;;  %v1231_v56 = vld [vmem:[#allocation2 + $0x598] sm:$0xff]  ;;  %v1273_v57 = vld [vmem:[#allocation2 + $0x6e8] sm:$0xff] }
 0x343   :  { %2964 = vmatpush3.msra.mxu1 %v525_v55  ;;  %2706 = vmatpush3.msra.mxu0 %v1227_v58  ;;  %v904_v50 = vsel %vm167_vm2, %v901_v54, %v903_v7  ;;  %v928_v8 = vsel %vm63_vm0, %v925_v62, %v927_v61  ;;  %v916_v13 = vsel %vm563_vm4, %v913_v44, %v915_v11  ;;  %v1258_v55 = vld [vmem:[#allocation2 + $0x670] sm:$0xff]  ;;  %v1215_v58 = vld [vmem:[#allocation2 + $0x518] sm:$0xff]  ;;  %v1257_v60 = vld [vmem:[#allocation2 + $0x668] sm:$0xff] }
 0x344   :  { %2965 = vmatprep.subr.mxu1 %v524_v53  ;;  %1003 = vmatmul.mubr.f32.gmra.mxu1 %v3456_v41  ;;  %v1230_v54 = vld [vmem:[#allocation2 + $0x590] sm:$0xff]  ;;  %v1256_v62 = vld [vmem:[#allocation2 + $0x660] sm:$0xff]  ;;  %v1269_v7 = vld [vmem:[#allocation2 + $0x6c8] sm:$0xff] }
 0x345   :  { %1088 = vmatmul.mubr.f32.gmra.mxu0 %v912_v0  ;;  %2966 = vmatpush3.msra.mxu1 %v524_v53  ;;  %v1272_v53 = vld [vmem:[#allocation2 + $0x6e0] sm:$0xff]  ;;  %v1214_v63 = vld [vmem:[#allocation2 + $0x510] sm:$0xff]  ;;  %v1229_v0 = vld [vmem:[#allocation2 + $0x588] sm:$0xff] }
 0x346   :  { %1007 = vmatprep.mubr.f32.mxu1 %v902_v3  ;;  %1092 = vmatprep.mubr.f32.mxu0 %v926_v4  ;;  %v1270_v3 = vld [vmem:[#allocation2 + $0x6d0] sm:$0xff]  ;;  %v1228_v4 = vld [vmem:[#allocation2 + $0x580] sm:$0xff]  ;;  %v1253_v61 = vld [vmem:[#allocation2 + $0x648] sm:$0xff] }
 0x347   :  { %2967 = vmatprep.subr.mxu1 %v523_v1  ;;  %2707 = vmatprep.subr.mxu0 %v1242_v2  ;;  %v1213_v2 = vld [vmem:[#allocation2 + $0x508] sm:$0xff]  ;;  %v1254_v44 = vld [vmem:[#allocation2 + $0x650] sm:$0xff]  ;;  %v1251_v11 = vld [vmem:[#allocation2 + $0x638] sm:$0xff] }
 0x348   :  { %2968 = vmatpush3.msra.mxu1 %v523_v1  ;;  %2708 = vmatpush3.msra.mxu0 %v1226_v24  ;;  %v1255_v1 = vld [vmem:[#allocation2 + $0x658] sm:$0xff] }
 0x349   :  { %2969 = vmatprep.subr.mxu1 %v522_v5  ;;  %1008 = vmatmul.mubr.f32.gmra.mxu1 %v3219_v14  ;;  %v1263_v24 = vld [vmem:[#allocation2 + $0x698] sm:$0xff] }
 0x34a   :  { %1093 = vmatmul.mubr.f32.gmra.mxu0 %v914_v10  ;;  %2970 = vmatpush3.msra.mxu1 %v522_v5  ;;  %v1212_v5 = vld [vmem:[#allocation2 + $0x500] sm:$0xff]  ;;  %v1291_v10 = vld [vmem:[#allocation2 + $0x778] sm:$0xff] }
 0x34b   :  { %1012 = vmatprep.mubr.f32.mxu1 %v904_v50  ;;  %1097 = vmatprep.mubr.f32.mxu0 %v928_v8  ;;  %v1252_v50 = vld [vmem:[#allocation2 + $0x640] sm:$0xff]  ;;  %v1290_v8 = vld [vmem:[#allocation2 + $0x770] sm:$0xff] }
 0x34c   :  { %2971 = vmatprep.subr.mxu1 %v521_v6  ;;  %2709 = vmatprep.subr.mxu0 %v1241_v25  ;;  %v1247_v25 = vld [vmem:[#allocation2 + $0x618] sm:$0xff] }
 0x34d   :  { %2972 = vmatpush3.msra.mxu1 %v521_v6  ;;  %2710 = vmatpush3.msra.mxu0 %v1225_v27  ;;  %v1268_v6 = vld [vmem:[#allocation2 + $0x6c0] sm:$0xff]  ;;  %v1285_v27 = vld [vmem:[#allocation2 + $0x748] sm:$0xff] }
 0x34e   :  { %2973 = vmatprep.subr.mxu1 %v520_v9  ;;  %1013 = vmatmul.mubr.f32.gmra.mxu1 %v3461_v45 }
 0x34f   :  { %1098 = vmatmul.mubr.f32.gmra.mxu0 %v916_v13  ;;  %2974 = vmatpush3.msra.mxu1 %v520_v9  ;;  %v1267_v9 = vld [vmem:[#allocation2 + $0x6b8] sm:$0xff]  ;;  %v1266_v13 = vld [vmem:[#allocation2 + $0x6b0] sm:$0xff] }
 0x350   :  { %2975 = vmatprep.subr.mxu1 %v519_v12  ;;  %2993 = vmatprep.mubr.f32.mxu1 %v3456_v41  ;;  %v1236_v41 = vld [vmem:[#allocation2 + $0x5c0] sm:$0xff] }
 0x351   :  { %2976 = vmatpush3.msra.mxu1 %v519_v12  ;;  %1433 = vmatprep.mubr.f32.mxu0 %v3414_v26  ;;  %v1289_v12 = vld [vmem:[#allocation2 + $0x768] sm:$0xff] }
 0x352   :  { %2977 = vmatprep.subr.mxu1 %v518_v15  ;;  %2711 = vmatprep.subr.mxu0 %v1240_v28  ;;  %v1262_v28 = vld [vmem:[#allocation2 + $0x690] sm:$0xff] }
 0x353   :  { %2978 = vmatpush3.msra.mxu1 %v518_v15  ;;  %2712 = vmatpush3.msra.mxu0 %v1224_v29  ;;  %v1250_v15 = vld [vmem:[#allocation2 + $0x630] sm:$0xff] }
 0x354   :  { %2979 = vmatprep.subr.mxu1 %v517_v16  ;;  %2713 = vmatprep.subr.mxu0 %v1239_v31  ;;  %v1246_v29 = vld [vmem:[#allocation2 + $0x610] sm:$0xff]  ;;  %v1284_v31 = vld [vmem:[#allocation2 + $0x740] sm:$0xff] }
 0x355   :  { %2980 = vmatpush3.msra.mxu1 %v517_v16  ;;  %2714 = vmatpush3.msra.mxu0 %v1223_v33  ;;  %v1288_v16 = vld [vmem:[#allocation2 + $0x760] sm:$0xff]  ;;  %v1261_v33 = vld [vmem:[#allocation2 + $0x688] sm:$0xff] }
 0x356   :  { %2981 = vmatprep.subr.mxu1 %v516_v17  ;;  %2715 = vmatprep.subr.mxu0 %v1238_v34  ;;  %v1245_v34 = vld [vmem:[#allocation2 + $0x608] sm:$0xff] }
 0x357   :  { %2982 = vmatpush3.msra.mxu1 %v516_v17  ;;  %2716 = vmatpush3.msra.mxu0 %v1222_v35  ;;  %v1265_v17 = vld [vmem:[#allocation2 + $0x6a8] sm:$0xff]  ;;  %v1283_v35 = vld [vmem:[#allocation2 + $0x738] sm:$0xff] }
 0x358   :  { %2983 = vmatprep.subr.mxu1 %v515_v18  ;;  %2717 = vmatprep.subr.mxu0 %v1237_v36  ;;  %v1260_v36 = vld [vmem:[#allocation2 + $0x680] sm:$0xff] }
 0x359   :  { %2984 = vmatpush3.msra.mxu1 %v515_v18  ;;  %v1249_v18 = vld [vmem:[#allocation2 + $0x628] sm:$0xff] }
 0x35a   :  { %2985 = vmatprep.subr.mxu1 %v514_v19 }
 0x35b   :  { %2986 = vmatpush3.msra.mxu1 %v514_v19  ;;  %v1287_v19 = vld [vmem:[#allocation2 + $0x758] sm:$0xff] }
 0x35c   :  { %2987 = vmatprep.subr.mxu1 %v513_v21 }
 0x35d   :  { %2988 = vmatpush3.msra.mxu1 %v513_v21  ;;  %v1264_v21 = vld [vmem:[#allocation2 + $0x6a0] sm:$0xff] }
 0x35e   :  { %2989 = vmatprep.subr.mxu1 %v512_v22 }
 0x35f   :  { %2990 = vmatpush3.msra.mxu1 %v512_v22  ;;  %v1248_v22 = vld [vmem:[#allocation2 + $0x620] sm:$0xff] }
 0x360   :  { %2991 = vmatprep.subr.mxu1 %v511_v23 }
 0x361   :  { %2992 = vmatpush3.msra.mxu1 %v511_v23  ;;  %v1286_v23 = vld [vmem:[#allocation2 + $0x750] sm:$0xff] }
 0x362   :  { %2994 = vmatmul.mubr.f32.vlgmr.msra.gmra.mxu1 %v3454_v40  ;;  %v1221_v40 = vld [vmem:[#allocation2 + $0x548] sm:$0xff] }
 0x363   :  { %2996 = vmatprep.mubr.f32.mxu1 %v3461_v45  ;;  %2718 = vmatpush3.msra.mxu0 %v1221_v40  ;;  %v1275_v45 = vld [vmem:[#allocation2 + $0x6f8] sm:$0xff]  ;;  %v1244_v40 = vld [vmem:[#allocation2 + $0x600] sm:$0xff] }
 0x364   :  { %2719 = vmatprep.subr.mxu0 %v1236_v41  ;;  %2749 = vmatprep.subr.mxu1 %v1275_v45  ;;  %v1282_v41 = vld [vmem:[#allocation2 + $0x730] sm:$0xff]  ;;  %v1276_v45 = vld [vmem:[#allocation2 + $0x700] sm:$0xff] }
 0x365   :  { %2720 = vmatpush3.msra.mxu0 %v1220_v20  ;;  %2750 = vmatpush3.msra.mxu1 %v1259_v51  ;;  %v3502_v20 = vld [vmem:[#allocation2 + $0x948] sm:$0xff] }
 0x366   :  { %2997 = vmatmul.mubr.f32.gmra.mxu1 %v3477_v43  ;;  %2721 = vmatprep.subr.mxu0 %v1235_v42  ;;  %v1271_v43 = vld [vmem:[#allocation2 + $0x6d8] sm:$0xff]  ;;  %v1281_v42 = vld [vmem:[#allocation2 + $0x728] sm:$0xff] }
 0x367   :  { %2722 = vmatpush3.msra.mxu0 %v1219_v47  ;;  %2751 = vmatprep.subr.mxu1 %v1274_v46  ;;  %v1280_v47 = vld [vmem:[#allocation2 + $0x720] sm:$0xff] }
 0x368   :  { %2723 = vmatprep.subr.mxu0 %v1234_v48  ;;  %2752 = vmatpush3.msra.mxu1 %v1258_v55  ;;  %v1279_v48 = vld [vmem:[#allocation2 + $0x718] sm:$0xff] }
 0x369   :  { %2724 = vmatpush3.msra.mxu0 %v1218_v49  ;;  %2753 = vmatprep.subr.mxu1 %v1273_v57  ;;  %v1278_v49 = vld [vmem:[#allocation2 + $0x710] sm:$0xff] }
 0x36a   :  { %2725 = vmatprep.subr.mxu0 %v1233_v59  ;;  %2754 = vmatpush3.msra.mxu1 %v1257_v60  ;;  %v1277_v59 = vld [vmem:[#allocation2 + $0x708] sm:$0xff] }
 0x36b   :  { %2726 = vmatpush3.msra.mxu0 %v1217_v32  ;;  %2755 = vmatprep.subr.mxu1 %v1272_v53  ;;  %v2957_v32 = vpop.f32.mrf.mxu0 }
 0x36c   :  { %2727 = vmatprep.subr.mxu0 %v1232_v52  ;;  %2756 = vmatpush3.msra.mxu1 %v1256_v62 }
 0x36d   :  { %2728 = vmatpush3.msra.mxu0 %v1216_v39  ;;  %2757 = vmatprep.subr.mxu1 %v1271_v43  ;;  %v858_v51 = vpop.f32.mrf.mxu0 }
 0x36e   :  { %2729 = vmatprep.subr.mxu0 %v1231_v56  ;;  %2758 = vmatpush3.msra.mxu1 %v1255_v1 }
 0x36f   :  { %2730 = vmatpush3.msra.mxu0 %v1215_v58  ;;  %2759 = vmatprep.subr.mxu1 %v1270_v3  ;;  %v2960_v52 = vpop.f32.mrf.mxu0 }
 0x370   :  { %2731 = vmatprep.subr.mxu0 %v1230_v54  ;;  %2760 = vmatpush3.msra.mxu1 %v1254_v44 }
 0x371   :  { %2732 = vmatpush3.msra.mxu0 %v1214_v63  ;;  %2761 = vmatprep.subr.mxu1 %v1269_v7  ;;  %v868_v46 = vpop.f32.mrf.mxu0 }
 0x372   :  { %2733 = vmatprep.subr.mxu0 %v1229_v0  ;;  %2762 = vmatpush3.msra.mxu1 %v1253_v61 }
 0x373   :  { %2734 = vmatpush3.msra.mxu0 %v1213_v2  ;;  %2763 = vmatprep.subr.mxu1 %v1268_v6 }
 0x374   :  { %2735 = vmatprep.subr.mxu0 %v1228_v4  ;;  %2764 = vmatpush3.msra.mxu1 %v1252_v50 }
 0x375   :  { %2736 = vmatpush3.msra.mxu0 %v1212_v5  ;;  %2765 = vmatprep.subr.mxu1 %v1267_v9 }
 0x376   :  { %1434 = vmatmul.mubr.f32.vlgmr.msra.gmra.mxu0 %v3219_v14  ;;  %2999 = vmatprep.subr.mxu0 %v1291_v10 }
 0x377   :  { %3000 = vmatpush3.msra.mxu0 %v1291_v10  ;;  %2766 = vmatpush3.msra.mxu1 %v1251_v11 }
 0x378   :  { %3001 = vmatprep.subr.mxu0 %v1290_v8  ;;  %2767 = vmatprep.subr.mxu1 %v1266_v13 }
 0x379   :  { %3002 = vmatpush3.msra.mxu0 %v1290_v8  ;;  %2768 = vmatpush3.msra.mxu1 %v1250_v15  ;;  %v2485_v8 = vld [vmem:[#allocation2 + $0x4b0] ss:$0 sm:$0xff] }
 0x37a   :  { %3003 = vmatprep.subr.mxu0 %v1289_v12  ;;  %2769 = vmatprep.subr.mxu1 %v1265_v17  ;;  %v2484_v17 = vld [vmem:[#allocation2 + $0x4f8] ss:$0 sm:$0xff] }
 0x37b   :  { %3004 = vmatpush3.msra.mxu0 %v1289_v12  ;;  %2770 = vmatpush3.msra.mxu1 %v1249_v18 }
 0x37c   :  { %3005 = vmatprep.subr.mxu0 %v1288_v16  ;;  %2771 = vmatprep.subr.mxu1 %v1264_v21 }
 0x37d   :  { %3006 = vmatpush3.msra.mxu0 %v1288_v16  ;;  %2772 = vmatpush3.msra.mxu1 %v1248_v22 }
 0x37e   :  { %3007 = vmatprep.subr.mxu0 %v1287_v19  ;;  %2773 = vmatprep.subr.mxu1 %v1263_v24 }
 0x37f   :  { %3008 = vmatpush3.msra.mxu0 %v1287_v19  ;;  %2774 = vmatpush3.msra.mxu1 %v1247_v25 }
 0x380   :  { %3009 = vmatprep.subr.mxu0 %v1286_v23  ;;  %2775 = vmatprep.subr.mxu1 %v1262_v28  ;;  %v882_v28 = vadd.f32 %v2957_v32, %v2484_v17 }
 0x381   :  { %3010 = vmatpush3.msra.mxu0 %v1286_v23  ;;  %2776 = vmatpush3.msra.mxu1 %v1246_v29 }
 0x382   :  { %3011 = vmatprep.subr.mxu0 %v1285_v27  ;;  %2777 = vmatprep.subr.mxu1 %v1261_v33 }
 0x383   :  { %3012 = vmatpush3.msra.mxu0 %v1285_v27  ;;  %2778 = vmatpush3.msra.mxu1 %v1245_v34 }
 0x384   :  { %3013 = vmatprep.subr.mxu0 %v1284_v31  ;;  %2779 = vmatprep.subr.mxu1 %v1260_v36  ;;  %v881_v36 = vadd.f32 %v2484_v17, %v858_v51 }
 0x385   :  { %3014 = vmatpush3.msra.mxu0 %v1284_v31  ;;  %2780 = vmatpush3.msra.mxu1 %v1244_v40 }
 0x386   :  { %3015 = vmatprep.subr.mxu0 %v1283_v35  ;;  %3037 = vmatprep.subr.mxu1 %v3502_v20 }
 0x387   :  { %3016 = vmatpush3.msra.mxu0 %v1283_v35 }
 0x388   :  { %3017 = vmatprep.subr.mxu0 %v1282_v41 }
 0x389   :  { %3018 = vmatpush3.msra.mxu0 %v1282_v41 }
 0x38a   :  { %3019 = vmatprep.subr.mxu0 %v1281_v42 }
 0x38b   :  { %3020 = vmatpush3.msra.mxu0 %v1281_v42 }
 0x38c   :  { %3021 = vmatprep.subr.mxu0 %v1280_v47 }
 0x38d   :  { %3022 = vmatpush3.msra.mxu0 %v1280_v47 }
 0x38e   :  { %3023 = vmatprep.subr.mxu0 %v1279_v48 }
 0x38f   :  { %3024 = vmatpush3.msra.mxu0 %v1279_v48 }
 0x390   :  { %3025 = vmatprep.subr.mxu0 %v1278_v49 }
 0x391   :  { %3026 = vmatpush3.msra.mxu0 %v1278_v49 }
 0x392   :  { %3027 = vmatprep.subr.mxu0 %v1277_v59 }
 0x393   :  { %3028 = vmatpush3.msra.mxu0 %v1277_v59  ;;  %v883_v59 = vadd.f32 %v2484_v17, %v868_v46 }
 0x394   :  { %3029 = vmatprep.subr.mxu0 %v1276_v45 }
 0x395   :  { %3030 = vmatpush3.msra.mxu0 %v1276_v45 }
 0x400   :  { %v2629_v39 = vpop.f32.mrf.mxu1  ;;  %v2673_v55 = vpop.f32.mrf.mxu0 }
 0x402   :  { %v2630_v56 = vpop.f32.mrf.mxu1  ;;  %v2674_v57 = vpop.f32.mrf.mxu0 }
 0x403   :  { %v2631_v7 = vadd.f32 %v2630_v56, %v2629_v39  ;;  %v2675_v61 = vadd.f32 %v2674_v57, %v2673_v55 }
 0x404   :  { %v2632_v58 = vpop.f32.mrf.mxu1 }
 0x405   :  { %v2676_v60 = vpop.f32.mrf.mxu0  ;;  %v1085_v15 = vadd.f32 %v2675_v61, %v2631_v7  ;;  %v1341_v7 = vld [vmem:[#allocation2 + $0x908] sm:$0xff]  ;;  %v1340_v61 = vld [vmem:[#allocation2 + $0x900] sm:$0xff] }
 0x406   :  { %v2633_v53 = vpop.f32.mrf.mxu1 }
 0x407   :  { %v2677_v54 = vpop.f32.mrf.mxu0  ;;  %v2634_v3 = vadd.f32 %v2633_v53, %v2632_v58  ;;  %v884_v58 = vadd.f32 %v2960_v52, %v2484_v17  ;;  %v1347_v52 = vld [vmem:[#allocation2 + $0x938] sm:$0xff]  ;;  %v1328_v17 = vld [vmem:[#allocation2 + $0x8a0] sm:$0xff] }
 0x408   :  { %v2678_v4 = vadd.f32 %v2677_v54, %v2676_v60 }
 0x409   :  { %v2635_v62 = vpop.f32.mrf.mxu1 }
 0x40a   :  { %v2679_v63 = vpop.f32.mrf.mxu0  ;;  %v1090_v50 = vadd.f32 %v2678_v4, %v2634_v3  ;;  %v1344_v3 = vld [vmem:[#allocation2 + $0x920] sm:$0xff] }
 0x40b   :  { %v2636_v43 = vpop.f32.mrf.mxu1 }
 0x40c   :  { %v2680_v0 = vpop.f32.mrf.mxu0  ;;  %v2637_v11 = vadd.f32 %v2636_v43, %v2635_v62  ;;  %v1348_v62 = vld [vmem:[#allocation2 + $0x940] sm:$0xff] }
 0x40d   :  { %v2681_v12 = vadd.f32 %v2680_v0, %v2679_v63 }
 0x40e   :  { %v2638_v1 = vpop.f32.mrf.mxu1 }
 0x40f   :  { %v2682_v2 = vpop.f32.mrf.mxu0  ;;  %v1095_v27 = vadd.f32 %v2681_v12, %v2637_v11  ;;  %v1334_v11 = vld [vmem:[#allocation2 + $0x8d0] sm:$0xff]  ;;  %v1332_v12 = vld [vmem:[#allocation2 + $0x8c0] sm:$0xff] }
 0x410   :  { %v2639_v44 = vpop.f32.mrf.mxu1 }
 0x411   :  { %v2683_v5 = vpop.f32.mrf.mxu0  ;;  %v2640_v10 = vadd.f32 %v2639_v44, %v2638_v1  ;;  %v1346_v1 = vld [vmem:[#allocation2 + $0x930] sm:$0xff]  ;;  %v1343_v44 = vld [vmem:[#allocation2 + $0x918] sm:$0xff] }
 0x412   :  { %v2684_v6 = vadd.f32 %v2683_v5, %v2682_v2  ;;  %v1345_v2 = vld [vmem:[#allocation2 + $0x928] sm:$0xff]  ;;  %v1342_v5 = vld [vmem:[#allocation2 + $0x910] sm:$0xff] }
 0x414   :  { %v1100_v21 = vadd.f32 %v2684_v6, %v2640_v10  ;;  %v1339_v10 = vld [vmem:[#allocation2 + $0x8f8] sm:$0xff]  ;;  %v1338_v6 = vld [vmem:[#allocation2 + $0x8f0] sm:$0xff] }
 0x422   :  { %v2995_v9 = vpop.f32.mrf.mxu1 }
 0x423   :  { %v1175_v13 = vadd.f32 %v2995_v9, %v1090_v50  ;;  %v1337_v50 = vld [vmem:[#allocation2 + $0x8e8] sm:$0xff]  ;;  %v1335_v9 = vld [vmem:[#allocation2 + $0x8d8] sm:$0xff] }
 0x424   :  { %v1169_v16 = vpop.f32.mrf.mxu1 }
 0x425   :  { %v1193_v18 = vadd.f32 %v2485_v8, %v1175_v13  ;;  %v1170_v19 = vadd.f32 %v1169_v16, %v1085_v15  ;;  %v1331_v13 = vld [vmem:[#allocation2 + $0x8b8] sm:$0xff]  ;;  %v1330_v15 = vld [vmem:[#allocation2 + $0x8b0] sm:$0xff]  ;;  %v1329_v16 = vld [vmem:[#allocation2 + $0x8a8] sm:$0xff] }
 0x426   :  { %v2998_v22 = vpop.f32.mrf.mxu1 }
 0x427   :  { %v1197_v23 = vmul.f32 0.2, %v1193_v18  ;;  %v1192_v24 = vadd.f32 %v2485_v8, %v1170_v19  ;;  %v1185_v25 = vadd.f32 %v2998_v22, %v1100_v21  ;;  %v1326_v19 = vld [vmem:[#allocation2 + $0x890] sm:$0xff]  ;;  %v1325_v21 = vld [vmem:[#allocation2 + $0x888] sm:$0xff]  ;;  %v1324_v22 = vld [vmem:[#allocation2 + $0x880] sm:$0xff] }
 0x428   :  { %v1179_v29 = vpop.f32.mrf.mxu1  ;;  %2833 = vmatprep.subr.mxu0 %v1324_v22 }
 0x429   :  { %v1201_v31 = vmax.f32 %v1193_v18, %v1197_v23  ;;  %v1196_v33 = vmul.f32 0.2, %v1192_v24  ;;  %v1195_v34 = vadd.f32 %v2485_v8, %v1185_v25  ;;  %v1180_v35 = vadd.f32 %v1179_v29, %v1095_v27  ;;  %v1327_v18 = vld [vmem:[#allocation2 + $0x898] sm:$0xff]  ;;  %v1308_v23 = vld [vmem:[#allocation2 + $0x800] sm:$0xff]  ;;  %v1322_v27 = vld [vmem:[#allocation2 + $0x870] sm:$0xff] }
 0x42a   :  { %v1307_v25 = vld [vmem:[#allocation2 + $0x7f8] sm:$0xff]  ;;  %v1321_v29 = vld [vmem:[#allocation2 + $0x868] sm:$0xff] }
 0x42b   :  { %v1205_v40 = vadd.f32 %v1201_v31, %v882_v28  ;;  %v1200_v41 = vmax.f32 %v1192_v24, %v1196_v33  ;;  %v1194_v42 = vadd.f32 %v2485_v8, %v1180_v35  ;;  %v1199_v47 = vmul.f32 0.2, %v1195_v34  ;;  %v1336_v8 = vld [vmem:[#allocation2 + $0x8e0] sm:$0xff]  ;;  %v1323_v24 = vld [vmem:[#allocation2 + $0x878] sm:$0xff]  ;;  %v1306_v28 = vld [vmem:[#allocation2 + $0x7f0] sm:$0xff] }
 0x42c   :  { %v1305_v31 = vld [vmem:[#allocation2 + $0x7e8] sm:$0xff]  ;;  %v1320_v33 = vld [vmem:[#allocation2 + $0x860] sm:$0xff]  ;;  %v1319_v35 = vld [vmem:[#allocation2 + $0x858] sm:$0xff] }
 0x42d   :  { %v1204_v48 = vadd.f32 %v1200_v41, %v881_v36  ;;  %v1198_v49 = vmul.f32 0.2, %v1194_v42  ;;  %v3505_v45 = vmax.f32 %v1205_v40, 0.0  ;;  %v1203_v56 = vmax.f32 %v1195_v34, %v1199_v47  ;;  %v1304_v34 = vld [vmem:[#allocation2 + $0x7e0] sm:$0xff]  ;;  %v1303_v36 = vld [vmem:[#allocation2 + $0x7d8] sm:$0xff]  ;;  %v1318_v40 = vld [vmem:[#allocation2 + $0x850] sm:$0xff] }
 0x42e   :  { %v1302_v41 = vld [vmem:[#allocation2 + $0x7d0] sm:$0xff]  ;;  %v1301_v47 = vld [vmem:[#allocation2 + $0x7c8] sm:$0xff] }
 0x42f   :  { %v1208_v39 = vmax.f32 %v1204_v48, 0.0  ;;  %v1202_v55 = vmax.f32 %v1194_v42, %v1198_v49  ;;  %v1363_v53 = vrot.slane %v3505_v45, 4  ;;  %v1207_v54 = vadd.f32 %v1203_v56, %v884_v58  ;;  %v1317_v42 = vld [vmem:[#allocation2 + $0x848] sm:$0xff]  ;;  %v1316_v48 = vld [vmem:[#allocation2 + $0x840] sm:$0xff] }
 0x430   :  { %v1300_v49 = vld [vmem:[#allocation2 + $0x7c0] sm:$0xff]  ;;  %v1313_v56 = vld [vmem:[#allocation2 + $0x828] sm:$0xff] }
 0x431   :  { %v1206_v57 = vadd.f32 %v1202_v55, %v883_v59  ;;  %v1354_v32 = vrot.slane %v1208_v39, 4  ;;  %v1211_v43 = vmax.f32 %v1207_v54, 0.0  ;;  %v1315_v59 = vld [vmem:[#allocation2 + $0x838] sm:$0xff]  ;;  %v1298_v55 = vld [vmem:[#allocation2 + $0x7b0] sm:$0xff]  ;;  %v1296_v58 = vld [vmem:[#allocation2 + $0x7a0] sm:$0xff] }
 0x432   :  { %v1294_v54 = vld [vmem:[#allocation2 + $0x790] sm:$0xff] }
 0x433   :  { %v3507_v60 = vmax.f32 %v1206_v57, 0.0  ;;  %v1355_v51 = vsel %vm563_vm4, %v3414_v26, %v1354_v32  ;;  %v1364_v46 = vsel %vm563_vm4, %v1354_v32, %v1363_v53  ;;  %v1297_v57 = vld [vmem:[#allocation2 + $0x7a8] sm:$0xff]  ;;  %v1312_v32 = vld [vmem:[#allocation2 + $0x820] sm:$0xff]  ;;  %v1310_v53 = vld [vmem:[#allocation2 + $0x810] sm:$0xff] }
 0x434   :  { %1438 = vmatprep.mubr.f32.mxu0 %v1355_v51  ;;  %1518 = vmatprep.mubr.f32.mxu1 %v1355_v51  ;;  %v1295_v51 = vld [vmem:[#allocation2 + $0x798] sm:$0xff] }
 0x435   :  { %1439 = vmatmul.mubr.f32.gmra.mxu0 %v3219_v14  ;;  %1519 = vmatmul.mubr.f32.vlgmr.msra.gmra.mxu1 %v3219_v14  ;;  %v1356_v63 = vrot.slane %v3507_v60, 4 }
 0x436   :  { %3038 = vmatpush3.msra.mxu1 %v3502_v20  ;;  %1523 = vmatprep.mubr.f32.mxu1 %v1364_v46  ;;  %v1365_v20 = vrot.slane %v1211_v43, 4  ;;  %v2737_v46 = vpop.f32.mrf.mxu0 }
 0x437   :  { %3039 = vmatprep.subr.mxu1 %v1348_v62  ;;  %1443 = vmatprep.mubr.f32.mxu0 %v3414_v26  ;;  %v1357_v0 = vsel %vm563_vm4, %v3414_v26, %v1356_v63 }
 0x438   :  { %3040 = vmatpush3.msra.mxu1 %v1348_v62  ;;  %v1366_v4 = vsel %vm563_vm4, %v1356_v63, %v1365_v20  ;;  %v1309_v62 = vld [vmem:[#allocation2 + $0x808] sm:$0xff]  ;;  %v2738_v63 = vpop.f32.mrf.mxu0 }
 0x439   :  { %3041 = vmatprep.subr.mxu1 %v1347_v52  ;;  %1444 = vmatmul.mubr.f32.gmra.mxu0 %v3219_v14 }
 0x43a   :  { %1524 = vmatmul.mubr.f32.gmra.mxu1 %v1208_v39  ;;  %1448 = vmatprep.mubr.f32.mxu0 %v1357_v0 }
 0x43b   :  { %3042 = vmatpush3.msra.mxu1 %v1347_v52  ;;  %1528 = vmatprep.mubr.f32.mxu1 %v1357_v0 }
 0x43c   :  { %3043 = vmatprep.subr.mxu1 %v1346_v1 }
 0x43d   :  { %3044 = vmatpush3.msra.mxu1 %v1346_v1  ;;  %1449 = vmatmul.mubr.f32.gmra.mxu0 %v3219_v14 }
 0x43e   :  { %3045 = vmatprep.subr.mxu1 %v1345_v2  ;;  %1529 = vmatmul.mubr.f32.gmra.mxu1 %v3219_v14 }
 0x43f   :  { %3046 = vmatpush3.msra.mxu1 %v1345_v2  ;;  %1533 = vmatprep.mubr.f32.mxu1 %v1366_v4 }
 0x440   :  { %3031 = vmatprep.mubr.f32.mxu0 %v1208_v39  ;;  %3047 = vmatprep.subr.mxu1 %v1344_v3 }
 0x441   :  { %3048 = vmatpush3.msra.mxu1 %v1344_v3  ;;  %3032 = vmatmul.mubr.f32.vlgmr.msra.gmra.mxu0 %v3505_v45 }
 0x442   :  { %3049 = vmatprep.subr.mxu1 %v1343_v44  ;;  %1534 = vmatmul.mubr.f32.gmra.mxu1 %v3507_v60 }
 0x443   :  { %3050 = vmatpush3.msra.mxu1 %v1343_v44  ;;  %3034 = vmatprep.mubr.f32.mxu0 %v3507_v60 }
 0x444   :  { %3051 = vmatprep.subr.mxu1 %v1342_v5  ;;  %3069 = vmatprep.mubr.f32.mxu1 %v1208_v39  ;;  %v1314_v39 = vld [vmem:[#allocation2 + $0x830] sm:$0xff] }
 0x445   :  { %3052 = vmatpush3.msra.mxu1 %v1342_v5  ;;  %3035 = vmatmul.mubr.f32.gmra.mxu0 %v1211_v43 }
 0x446   :  { %3053 = vmatprep.subr.mxu1 %v1341_v7  ;;  %2834 = vmatpush3.msra.mxu0 %v1308_v23 }
 0x447   :  { %3054 = vmatpush3.msra.mxu1 %v1341_v7  ;;  %2835 = vmatprep.subr.mxu0 %v1323_v24 }
 0x448   :  { %3055 = vmatprep.subr.mxu1 %v1340_v61  ;;  %2836 = vmatpush3.msra.mxu0 %v1307_v25 }
 0x449   :  { %3056 = vmatpush3.msra.mxu1 %v1340_v61  ;;  %2837 = vmatprep.subr.mxu0 %v1322_v27 }
 0x44a   :  { %3057 = vmatprep.subr.mxu1 %v1339_v10  ;;  %2838 = vmatpush3.msra.mxu0 %v1306_v28 }
 0x44b   :  { %3058 = vmatpush3.msra.mxu1 %v1339_v10  ;;  %2839 = vmatprep.subr.mxu0 %v1321_v29 }
 0x44c   :  { %3059 = vmatprep.subr.mxu1 %v1338_v6  ;;  %2840 = vmatpush3.msra.mxu0 %v1305_v31 }
 0x44d   :  { %3060 = vmatpush3.msra.mxu1 %v1338_v6  ;;  %2841 = vmatprep.subr.mxu0 %v1320_v33 }
 0x44e   :  { %3061 = vmatprep.subr.mxu1 %v1337_v50  ;;  %2842 = vmatpush3.msra.mxu0 %v1304_v34 }
 0x44f   :  { %3062 = vmatpush3.msra.mxu1 %v1337_v50  ;;  %2843 = vmatprep.subr.mxu0 %v1319_v35  ;;  %v2739_v50 = vadd.f32 %v2738_v63, %v2737_v46  ;;  %v1982_v63 = vld [vmem:[#allocation2 + $0x9d0] sm:$0xff] }
 0x450   :  { %3063 = vmatprep.subr.mxu1 %v1336_v8  ;;  %2844 = vmatpush3.msra.mxu0 %v1303_v36 }
 0x451   :  { %3064 = vmatpush3.msra.mxu1 %v1336_v8  ;;  %2845 = vmatprep.subr.mxu0 %v1318_v40 }
 0x452   :  { %3065 = vmatprep.subr.mxu1 %v1335_v9  ;;  %2846 = vmatpush3.msra.mxu0 %v1302_v41 }
 0x453   :  { %3066 = vmatpush3.msra.mxu1 %v1335_v9  ;;  %2847 = vmatprep.subr.mxu0 %v1317_v42 }
 0x454   :  { %3067 = vmatprep.subr.mxu1 %v1334_v11  ;;  %2848 = vmatpush3.msra.mxu0 %v1301_v47 }
 0x455   :  { %3068 = vmatpush3.msra.mxu1 %v1334_v11  ;;  %2849 = vmatprep.subr.mxu0 %v1316_v48  ;;  %v2486_v11 = vld [vmem:[#allocation2 + $0x780] ss:$0 sm:$0xff] }
 0x456   :  { %3070 = vmatmul.mubr.f32.vlgmr.msra.gmra.mxu1 %v3505_v45  ;;  %3075 = vmatprep.subr.mxu1 %v1332_v12  ;;  %v1299_v45 = vld [vmem:[#allocation2 + $0x7b8] sm:$0xff] }
 0x457   :  { %3072 = vmatprep.mubr.f32.mxu1 %v3507_v60  ;;  %3076 = vmatpush3.msra.mxu1 %v1332_v12  ;;  %v1311_v60 = vld [vmem:[#allocation2 + $0x818] sm:$0xff] }
 0x458   :  { %3077 = vmatprep.subr.mxu1 %v1331_v13  ;;  %2850 = vmatpush3.msra.mxu0 %v1300_v49 }
 0x459   :  { %3078 = vmatpush3.msra.mxu1 %v1331_v13  ;;  %2851 = vmatprep.subr.mxu0 %v1315_v59  ;;  %v1293_v13 = vld [vmem:[#allocation2 + $0x788] sm:$0xff] }
 0x45a   :  { %3073 = vmatmul.mubr.f32.gmra.mxu1 %v1211_v43  ;;  %3079 = vmatprep.subr.mxu1 %v1330_v15 }
 0x45b   :  { %3080 = vmatpush3.msra.mxu1 %v1330_v15  ;;  %2852 = vmatpush3.msra.mxu0 %v1299_v45 }
 0x45c   :  { %3081 = vmatprep.subr.mxu1 %v1329_v16  ;;  %2853 = vmatprep.subr.mxu0 %v1314_v39 }
 0x45d   :  { %3082 = vmatpush3.msra.mxu1 %v1329_v16  ;;  %2854 = vmatpush3.msra.mxu0 %v1298_v55 }
 0x45e   :  { %3083 = vmatprep.subr.mxu1 %v1328_v17  ;;  %2855 = vmatprep.subr.mxu0 %v1313_v56 }
 0x45f   :  { %3084 = vmatpush3.msra.mxu1 %v1328_v17  ;;  %2856 = vmatpush3.msra.mxu0 %v1297_v57 }
 0x460   :  { %3085 = vmatprep.subr.mxu1 %v1327_v18  ;;  %2857 = vmatprep.subr.mxu0 %v1312_v32 }
 0x461   :  { %3086 = vmatpush3.msra.mxu1 %v1327_v18  ;;  %2858 = vmatpush3.msra.mxu0 %v1296_v58 }
 0x462   :  { %3087 = vmatprep.subr.mxu1 %v1326_v19  ;;  %2859 = vmatprep.subr.mxu0 %v1311_v60 }
 0x463   :  { %3088 = vmatpush3.msra.mxu1 %v1326_v19  ;;  %2860 = vmatpush3.msra.mxu0 %v1295_v51 }
 0x464   :  { %3089 = vmatprep.subr.mxu1 %v1325_v21  ;;  %2861 = vmatprep.subr.mxu0 %v1310_v53 }
 0x465   :  { %3090 = vmatpush3.msra.mxu1 %v1325_v21  ;;  %2862 = vmatpush3.msra.mxu0 %v1294_v54 }
 0x466   :  { %2863 = vmatprep.subr.mxu0 %v1309_v62  ;;  %v1740_v62 = vpop.permute.xlu1 %1739 }
 0x467   :  { %2864 = vmatpush3.msra.mxu0 %v1293_v13  ;;  %v1990_v13 = vld [vmem:[#allocation2 + $0xa10] sm:$0xff] }
 0x468   :  { %2038 = vmatprep.subr.mxu0 %v3219_v14 }
 0x4f5   :  { %v2740_v52 = vpop.f32.mrf.mxu0  ;;  %v2781_v43 = vpop.f32.mrf.mxu1 }
 0x4f7   :  { %v2741_v0 = vpop.f32.mrf.mxu0  ;;  %v2782_v1 = vpop.f32.mrf.mxu1 }
 0x4f8   :  { %v2742_v7 = vadd.f32 %v2741_v0, %v2740_v52  ;;  %v2783_v61 = vadd.f32 %v2782_v1, %v2781_v43  ;;  %v1980_v0 = vld [vmem:[#allocation2 + $0x9c0] sm:$0xff] }
 0x4f9   :  { %v2743_v2 = vpop.f32.mrf.mxu0 }
 0x4fa   :  { %v2784_v20 = vpop.f32.mrf.mxu1  ;;  %v1521_v18 = vadd.f32 %v2783_v61, %v2739_v50  ;;  %v1974_v61 = vld [vmem:[#allocation2 + $0x990] sm:$0xff]  ;;  %v1971_v50 = vld [vmem:[#allocation2 + $0x978] sm:$0xff] }
 0x4fb   :  { %v2744_v3 = vpop.f32.mrf.mxu0 }
 0x4fc   :  { %v2785_v4 = vpop.f32.mrf.mxu1  ;;  %v2745_v21 = vadd.f32 %v2744_v3, %v2743_v2  ;;  %v1979_v2 = vld [vmem:[#allocation2 + $0x9b8] sm:$0xff]  ;;  %v1978_v3 = vld [vmem:[#allocation2 + $0x9b0] sm:$0xff] }
 0x4fd   :  { %v2786_v44 = vadd.f32 %v2785_v4, %v2784_v20  ;;  %v2746_v5 = vpop.f32.mrf.mxu0 }
 0x4fe   :  { %v2787_v10 = vpop.f32.mrf.mxu1 }
 0x4ff   :  { %v2747_v6 = vpop.f32.mrf.mxu0  ;;  %v1526_v9 = vadd.f32 %v2786_v44, %v2742_v7  ;;  %v1977_v44 = vld [vmem:[#allocation2 + $0x9a8] sm:$0xff]  ;;  %v1975_v7 = vld [vmem:[#allocation2 + $0x998] sm:$0xff] }
 0x500   :  { %v2788_v8 = vpop.f32.mrf.mxu1  ;;  %v2748_v25 = vadd.f32 %v2747_v6, %v2746_v5  ;;  %v1976_v5 = vld [vmem:[#allocation2 + $0x9a0] sm:$0xff] }
 0x501   :  { %v3033_v12 = vpop.f32.mrf.mxu0  ;;  %v2789_v15 = vadd.f32 %v2788_v8, %v2787_v10  ;;  %v1973_v10 = vld [vmem:[#allocation2 + $0x988] sm:$0xff]  ;;  %v1972_v6 = vld [vmem:[#allocation2 + $0x980] sm:$0xff]  ;;  %v1970_v8 = vld [vmem:[#allocation2 + $0x970] sm:$0xff] }
 0x502   :  { %v2790_v16 = vpop.f32.mrf.mxu1  ;;  %v1611_v17 = vadd.f32 %v3033_v12, %v1526_v9  ;;  %v1969_v9 = vld [vmem:[#allocation2 + $0x968] sm:$0xff]  ;;  %v1967_v12 = vld [vmem:[#allocation2 + $0x958] sm:$0xff] }
 0x503   :  { %v1605_v19 = vpop.f32.mrf.mxu0  ;;  %v1531_v31 = vadd.f32 %v2789_v15, %v2745_v21  ;;  %v2012_v15 = vld [vmem:[#allocation2 + $0xac0] sm:$0xff]  ;;  %v1987_v21 = vld [vmem:[#allocation2 + $0x9f8] sm:$0xff] }
 0x504   :  { %v1629_v22 = vadd.f32 %v2486_v11, %v1611_v17  ;;  %v2791_v23 = vpop.f32.mrf.mxu1  ;;  %v1606_v24 = vadd.f32 %v1605_v19, %v1521_v18  ;;  %3097 = vmatprep.subr.mxu1 %v2012_v15  ;;  %v2011_v17 = vld [vmem:[#allocation2 + $0xab8] sm:$0xff]  ;;  %v1988_v18 = vld [vmem:[#allocation2 + $0xa00] sm:$0xff]  ;;  %v2010_v19 = vld [vmem:[#allocation2 + $0xab0] sm:$0xff] }
 0x505   :  { %v2792_v27 = vadd.f32 %v2791_v23, %v2790_v16  ;;  %v3036_v28 = vpop.f32.mrf.mxu0  ;;  %v1989_v16 = vld [vmem:[#allocation2 + $0xa08] sm:$0xff]  ;;  %v1986_v23 = vld [vmem:[#allocation2 + $0x9f0] sm:$0xff] }
 0x506   :  { %v1628_v29 = vadd.f32 %v2486_v11, %v1606_v24  ;;  %v1726_v33 = vmul.f32 0.2, %v1629_v22  ;;  %v2008_v24 = vld [vmem:[#allocation2 + $0xaa0] sm:$0xff] }
 0x507   :  { %v1536_v34 = vadd.f32 %v2792_v27, %v2748_v25  ;;  %v1615_v35 = vpop.f32.mrf.mxu0  ;;  %v1985_v25 = vld [vmem:[#allocation2 + $0x9e8] sm:$0xff]  ;;  %v2007_v27 = vld [vmem:[#allocation2 + $0xa98] sm:$0xff] }
 0x508   :  { %v1725_v36 = vmul.f32 0.2, %v1628_v29  ;;  %v1616_v40 = vadd.f32 %v1615_v35, %v1531_v31  ;;  %v1730_v48 = vmax.f32 %v1629_v22, %v1726_v33  ;;  %v2009_v22 = vld [vmem:[#allocation2 + $0xaa8] sm:$0xff]  ;;  %v1983_v31 = vld [vmem:[#allocation2 + $0x9d8] sm:$0xff] }
 0x509   :  { %v1621_v41 = vadd.f32 %v3036_v28, %v1536_v34  ;;  %v1984_v28 = vld [vmem:[#allocation2 + $0x9e0] sm:$0xff]  ;;  %v2005_v33 = vld [vmem:[#allocation2 + $0xa88] sm:$0xff] }
 0x50a   :  { %v1729_v42 = vmax.f32 %v1628_v29, %v1725_v36  ;;  %v1630_v47 = vadd.f32 %v2486_v11, %v1616_v40  ;;  %v1750_v58 = vrot.slane %v1730_v48, 4  ;;  %v2006_v29 = vld [vmem:[#allocation2 + $0xa90] sm:$0xff] }
 0x50b   :  { %v1631_v49 = vadd.f32 %v2486_v11, %v1621_v41  ;;  %v1968_v11 = vld [vmem:[#allocation2 + $0x960] sm:$0xff] }
 0x50c   :  { %v1727_v59 = vmul.f32 0.2, %v1630_v47  ;;  %3091 = vmatprep.mubr.msk.f32.mxu1 %vm264_vm3, %v1729_v42  ;;  %v1735_v45 = vrot.slane %v1729_v42, 4 }
 0x50d   :  { %v1728_v39 = vmul.f32 0.2, %v1631_v49  ;;  %3092 = vmatmul.mubr.msk.f32.vlgmr.msra.gmra.mxu1 %vm264_vm3, %v1730_v48 }
 0x50e   :  { %v1731_v55 = vmax.f32 %v1630_v47, %v1727_v59  ;;  %v1736_v56 = vsel %vm563_vm4, %v3414_v26, %v1735_v45  ;;  %v1751_v51 = vsel %vm563_vm4, %v1735_v45, %v1750_v58  ;;  %3098 = vmatpush3.msra.mxu1 %v2012_v15  ;;  %v2504_v59 = vld [vmem:[#allocation2 + $0x8c8] ss:$0 sm:$0xff] }
 0x50f   :  { %v1732_v57 = vmax.f32 %v1631_v49, %v1728_v39  ;;  %1741 = vrot.lane.b32.xlu0 %v1736_v56, %s3220_s0  ;;  %3099 = vmatprep.subr.mxu1 %v2011_v17 }
 0x510   :  { %3094 = vmatprep.mubr.msk.f32.mxu1 %vm264_vm3, %v1731_v55  ;;  %v1737_v32 = vrot.slane %v1731_v55, 4  ;;  %3100 = vmatpush3.msra.mxu1 %v2011_v17 }
 0x511   :  { %3095 = vmatmul.mubr.msk.f32.gmra.mxu1 %vm264_vm3, %v1732_v57  ;;  %v1752_v53 = vrot.slane %v1732_v57, 4  ;;  %3101 = vmatprep.subr.mxu1 %v2010_v19 }
 0x512   :  { %v1738_v60 = vsel %vm563_vm4, %v3414_v26, %v1737_v32  ;;  %v1981_v26 = vld [vmem:[#allocation2 + $0x9c8] sm:$0xff]  ;;  %3102 = vmatpush3.msra.mxu1 %v2010_v19 }
 0x513   :  { %1743 = vrot.lane.b32.xlu1 %v1738_v60, %s3220_s0  ;;  %1754 = vrot.lane.b32.xlu0 %v1751_v51, %s3220_s0  ;;  %v1753_v54 = vsel %vm563_vm4, %v1737_v32, %v1752_v53  ;;  %v2487_v51 = vld [vmem:[#allocation2 + $0x950] ss:$0 sm:$0xff] }
 0x514   :  { %3103 = vmatprep.subr.mxu1 %v2009_v22 }
 0x515   :  { %3104 = vmatpush3.msra.mxu1 %v2009_v22 }
 0x516   :  { %3105 = vmatprep.subr.mxu1 %v2008_v24  ;;  %v3071_v34 = vpop.f32.mrf.mxu1 }
 0x517   :  { %1756 = vrot.lane.b32.xlu0 %v1753_v54, %s3220_s0  ;;  %2016 = vrot.lane.b32.xlu1 %v3219_v14, %s3220_s0 }
 0x518   :  { %3106 = vmatpush3.msra.mxu1 %v2008_v24  ;;  %v1698_v35 = vpop.f32.mrf.mxu1  ;;  %v3603_v24 = vld [vmem:[#allocation2 + $0xa18] ss:$0 sm:$0xff] }
 0x519   :  { %3107 = vmatprep.subr.mxu1 %v2007_v27  ;;  %v1721_v54 = vadd.f32 %v2487_v51, %v1698_v35  ;;  %v2000_v35 = vld [vmem:[#allocation2 + $0xa60] sm:$0xff] }
 0x51a   :  { %3108 = vmatpush3.msra.mxu1 %v2007_v27  ;;  %v3074_v36 = vpop.f32.mrf.mxu1  ;;  %v2003_v27 = vld [vmem:[#allocation2 + $0xa78] sm:$0xff] }
 0x51b   :  { %3109 = vmatprep.subr.mxu1 %v2006_v29 }
 0x51c   :  { %3110 = vmatpush3.msra.mxu1 %v2006_v29  ;;  %v1708_v40 = vpop.f32.mrf.mxu1 }
 0x51d   :  { %3111 = vmatprep.subr.mxu1 %v2005_v33 }
 0x51e   :  { %3112 = vmatpush3.msra.mxu1 %v2005_v33  ;;  %v2001_v33 = vld [vmem:[#allocation2 + $0xa68] sm:$0xff] }
 0x51f   :  { %3119 = vmatprep.subr.mxu1 %v2003_v27 }
 0x581   :  { %v1742_v46 = vpop.permute.xlu0 %1741 }
 0x582   :  { %2489 = vmatprep.mubr.msk.f32.mxu0 %vm3422_vm5, %v1742_v46 }
 0x583   :  { %2491 = vmatmul.mubr.msk.f32.vlgmr.msra.gmra.mxu0 %vm3422_vm5, %v1740_v62 }
 0x584   :  { %2039 = vmatpush1.msra.mxu0 %v1982_v63 }
 0x585   :  { %v1755_v52 = vpop.permute.xlu0 %1754  ;;  %2040 = vmatprep.subr.mxu0 %v3219_v14  ;;  %v1744_v1 = vpop.permute.xlu1 %1743 }
 0x586   :  { %v1763_v43 = vsel %vm264_vm3, %v1729_v42, %v1755_v52  ;;  %2041 = vmatpush1.msra.mxu0 %v1981_v26 }
 0x587   :  { %1842 = vmatprep.mubr.f32.mxu0 %v1763_v43  ;;  %2042 = vmatprep.subr.mxu0 %v3219_v14 }
 0x588   :  { %2493 = vmatmul.mubr.msk.f32.gmra.mxu0 %vm3422_vm5, %v1742_v46 }
 0x589   :  { %2495 = vmatprep.mubr.msk.f32.mxu0 %vm3422_vm5, %v1744_v1  ;;  %v1757_v20 = vpop.permute.xlu0 %1756  ;;  %2043 = vmatpush1.msra.mxu0 %v1980_v0 }
 0x58a   :  { %2044 = vmatprep.subr.mxu0 %v3219_v14  ;;  %v1764_v4 = vsel %vm264_vm3, %v1731_v55, %v1757_v20 }
 0x58b   :  { %2045 = vmatpush1.msra.mxu0 %v1979_v2 }
 0x58c   :  { %2497 = vmatmul.mubr.msk.f32.gmra.mxu0 %vm3422_vm5, %v1740_v62  ;;  %2046 = vmatprep.subr.mxu0 %v3219_v14 }
 0x58d   :  { %1852 = vmatprep.mubr.f32.mxu0 %v1764_v4  ;;  %2047 = vmatpush1.msra.mxu0 %v1978_v3  ;;  %v1722_v4 = vadd.f32 %v3071_v34, %v2487_v51 }
 0x58e   :  { %2048 = vmatprep.subr.mxu0 %v3219_v14 }
 0x58f   :  { %2049 = vmatpush1.msra.mxu0 %v1977_v44 }
 0x590   :  { %2499 = vmatmul.mubr.msk.f32.gmra.mxu0 %vm3422_vm5, %v1744_v1  ;;  %2050 = vmatprep.subr.mxu0 %v3219_v14 }
 0x591   :  { %2051 = vmatpush1.msra.mxu0 %v1976_v5 }
 0x592   :  { %2052 = vmatprep.subr.mxu0 %v3219_v14 }
 0x593   :  { %2053 = vmatpush1.msra.mxu0 %v1975_v7 }
 0x594   :  { %2054 = vmatprep.subr.mxu0 %v3219_v14 }
 0x595   :  { %2055 = vmatpush1.msra.mxu0 %v1974_v61  ;;  %v2017_v61 = vpop.permute.xlu1 %2016 }
 0x596   :  { %2056 = vmatprep.subr.mxu0 %v3219_v14 }
 0x597   :  { %2057 = vmatpush1.msra.mxu0 %v1973_v10 }
 0x598   :  { %2058 = vmatprep.subr.mxu0 %v3219_v14 }
 0x599   :  { %2059 = vmatpush1.msra.mxu0 %v1972_v6 }
 0x59a   :  { %2060 = vmatprep.subr.mxu0 %v3219_v14 }
 0x59b   :  { %2061 = vmatpush1.msra.mxu0 %v1971_v50 }
 0x59c   :  { %2062 = vmatprep.subr.mxu0 %v3219_v14 }
 0x59d   :  { %2063 = vmatpush1.msra.mxu0 %v1970_v8  ;;  %v1723_v8 = vadd.f32 %v2487_v51, %v1708_v40  ;;  %v1997_v40 = vld [vmem:[#allocation2 + $0xa48] sm:$0xff] }
 0x59e   :  { %2064 = vmatprep.subr.mxu0 %v3219_v14 }
 0x59f   :  { %2065 = vmatpush1.msra.mxu0 %v1969_v9 }
 0x5a0   :  { %2066 = vmatprep.subr.mxu0 %v3219_v14 }
 0x5a1   :  { %2067 = vmatpush1.msra.mxu0 %v1968_v11 }
 0x5a2   :  { %2068 = vmatprep.subr.mxu0 %v3219_v14 }
 0x5a3   :  { %2069 = vmatpush1.msra.mxu0 %v1967_v12 }
 0x5a4   :  { %2086 = vmatprep.subr.mxu0 %v3219_v14 }
 0x5a5   :  { %2087 = vmatpush2.msra.mxu0 %v1990_v13 }
 0x5a6   :  { %2088 = vmatprep.subr.mxu0 %v3219_v14 }
 0x5a7   :  { %2089 = vmatpush2.msra.mxu0 %v1989_v16  ;;  %v1724_v16 = vadd.f32 %v3074_v36, %v2487_v51  ;;  %v1998_v36 = vld [vmem:[#allocation2 + $0xa50] sm:$0xff] }
 0x5a8   :  { %2090 = vmatprep.subr.mxu0 %v3219_v14 }
 0x5a9   :  { %2091 = vmatpush2.msra.mxu0 %v1988_v18 }
 0x5aa   :  { %2092 = vmatprep.subr.mxu0 %v3219_v14 }
 0x5ab   :  { %2093 = vmatpush2.msra.mxu0 %v1987_v21 }
 0x5ac   :  { %2094 = vmatprep.subr.mxu0 %v3219_v14 }
 0x5ad   :  { %2095 = vmatpush2.msra.mxu0 %v1986_v23 }
 0x5ae   :  { %2096 = vmatprep.subr.mxu0 %v3219_v14 }
 0x5af   :  { %2097 = vmatpush2.msra.mxu0 %v1985_v25 }
 0x5b0   :  { %2098 = vmatprep.subr.mxu0 %v3219_v14 }
 0x5b1   :  { %2099 = vmatpush2.msra.mxu0 %v1984_v28  ;;  %v2002_v28 = vld [vmem:[#allocation2 + $0xa70] sm:$0xff] }
 0x5b2   :  { %2100 = vmatprep.subr.mxu0 %v3219_v14 }
 0x5b3   :  { %2101 = vmatpush2.msra.mxu0 %v1983_v31 }
 0x5cd   :  { %v3093_v41 = vpop.f32.mrf.mxu1 }
 0x5cf   :  { %v1924_v49 = vpop.f32.mrf.mxu1 }
 0x5d1   :  { %v3096_v32 = vpop.f32.mrf.mxu1 }
 0x5d3   :  { %v1934_v52 = vpop.f32.mrf.mxu1 }
 0x643   :  { %v2865_v42 = vpop.f32.mrf.mxu0 }
 0x645   :  { %v2866_v47 = vpop.f32.mrf.mxu0 }
 0x646   :  { %v2867_v48 = vadd.f32 %v2866_v47, %v2865_v42  ;;  %v1995_v42 = vld [vmem:[#allocation2 + $0xa38] sm:$0xff]  ;;  %v1994_v47 = vld [vmem:[#allocation2 + $0xa30] sm:$0xff] }
 0x648   :  { %v1925_v45 = vadd.f32 %v2867_v48, %v1924_v49  ;;  %v2868_v39 = vpop.f32.mrf.mxu0  ;;  %v1993_v48 = vld [vmem:[#allocation2 + $0xa28] sm:$0xff]  ;;  %v1992_v49 = vld [vmem:[#allocation2 + $0xa20] sm:$0xff] }
 0x64a   :  { %v1947_v55 = vadd.f32 %v2504_v59, %v1925_v45  ;;  %v2869_v56 = vpop.f32.mrf.mxu0 }
 0x64b   :  { %v2870_v57 = vadd.f32 %v2869_v56, %v2868_v39 }
 0x64c   :  { %v1951_v58 = vmul.f32 0.2, %v1947_v55  ;;  %v2871_v60 = vpop.f32.mrf.mxu0 }
 0x64d   :  { %v1930_v53 = vadd.f32 %v3093_v41, %v2870_v57  ;;  %v1996_v41 = vld [vmem:[#allocation2 + $0xa40] sm:$0xff] }
 0x64e   :  { %v1955_v62 = vmax.f32 %v1947_v55, %v1951_v58  ;;  %v2872_v46 = vpop.f32.mrf.mxu0 }
 0x64f   :  { %v1948_v63 = vadd.f32 %v2504_v59, %v1930_v53  ;;  %v2873_v26 = vadd.f32 %v2872_v46, %v2871_v60 }
 0x650   :  { %v2874_v43 = vpop.f32.mrf.mxu0  ;;  %v1959_v0 = vadd.f32 %v1955_v62, %v1721_v54 }
 0x651   :  { %v1952_v1 = vmul.f32 0.2, %v1948_v63  ;;  %v1935_v2 = vadd.f32 %v2873_v26, %v1934_v52 }
 0x652   :  { %v2875_v20 = vpop.f32.mrf.mxu0  ;;  %v1963_v3 = vmax.f32 %v1959_v0, 0.0 }
 0x653   :  { %v1956_v44 = vmax.f32 %v1948_v63, %v1952_v1  ;;  %v1949_v5 = vadd.f32 %v2504_v59, %v1935_v2  ;;  %v2876_v7 = vadd.f32 %v2875_v20, %v2874_v43 }
 0x654   :  { %3113 = vmatprep.mubr.msk.f32.mxu1 %vm264_vm3, %v1963_v3  ;;  %2018 = vrot.lane.b32.xlu0 %v1963_v3, %s3220_s0 }
 0x655   :  { %v1953_v10 = vmul.f32 0.2, %v1949_v5  ;;  %v1940_v6 = vadd.f32 %v3096_v32, %v2876_v7  ;;  %2505 = vmatprep.mubr.msk.f32.mxu0 %vm264_vm3, %v1963_v3  ;;  %v1960_v50 = vadd.f32 %v1956_v44, %v1722_v4 }
 0x656   :  { %2507 = vmatmul.mubr.msk.f32.vlgmr.msra.gmra.mxu0 %vm3422_vm5, %v2017_v61 }
 0x657   :  { %v1950_v9 = vadd.f32 %v2504_v59, %v1940_v6  ;;  %v1964_v11 = vmax.f32 %v1960_v50, 0.0  ;;  %v1957_v12 = vmax.f32 %v1949_v5, %v1953_v10  ;;  %v2388_v6 = vld [vmem:[#allocation2 + $0xad8] sm:$0x1] }
 0x658   :  { %2234 = vrot.lane.b32.xlu0 %v3219_v14, %s3221_s23  ;;  %3149 = vpush %v2388_v6 }
 0x659   :  { %v1954_v13 = vmul.f32 0.2, %v1950_v9  ;;  %2508 = vmatprep.mubr.msk.f32.mxu0 %vm264_vm3, %v1964_v11  ;;  %3114 = vmatmul.mubr.msk.f32.vlgmr.msra.gmra.mxu1 %vm264_vm3, %v1964_v11  ;;  %v1961_v15 = vadd.f32 %v1957_v12, %v1723_v8  ;;  %v2527_v12 = vld [vmem:[#allocation2 + $0xa80] ss:$0 sm:$0xff] }
 0x65a   :  { %3120 = vmatpush3.msra.mxu1 %v2003_v27  ;;  %v2528_v27 = vld [vmem:[#allocation2 + $0xad0] ss:$0 sm:$0xff] }
 0x65b   :  { %v1958_v17 = vmax.f32 %v1950_v9, %v1954_v13  ;;  %v1965_v18 = vmax.f32 %v1961_v15, 0.0  ;;  %3121 = vmatprep.subr.mxu1 %v2002_v28 }
 0x65c   :  { %3122 = vmatpush3.msra.mxu1 %v2002_v28 }
 0x65d   :  { %2020 = vrot.lane.b32.xlu1 %v1965_v18, %s3220_s0  ;;  %3116 = vmatprep.mubr.msk.f32.mxu1 %vm264_vm3, %v1965_v18  ;;  %v1962_v19 = vadd.f32 %v1958_v17, %v1724_v16  ;;  %v2522_v16 = vld [vmem:[#allocation2 + $0xac8] ss:$0 sm:$0xff] }
 0x65e   :  { %3123 = vmatprep.subr.mxu1 %v2001_v33 }
 0x65f   :  { %v1966_v21 = vmax.f32 %v1962_v19, 0.0  ;;  %3124 = vmatpush3.msra.mxu1 %v2001_v33 }
 0x660   :  { %3125 = vmatprep.subr.mxu1 %v2000_v35 }
 0x661   :  { %3117 = vmatmul.mubr.msk.f32.gmra.mxu1 %vm264_vm3, %v1966_v21 }
 0x662   :  { %3126 = vmatpush3.msra.mxu1 %v2000_v35 }
 0x663   :  { %3127 = vmatprep.subr.mxu1 %v1999_v30 }
 0x664   :  { %3128 = vmatpush3.msra.mxu1 %v1999_v30 }
 0x665   :  { %3129 = vmatprep.subr.mxu1 %v1998_v36 }
 0x666   :  { %3130 = vmatpush3.msra.mxu1 %v1998_v36 }
 0x667   :  { %3131 = vmatprep.subr.mxu1 %v1997_v40 }
 0x668   :  { %3132 = vmatpush3.msra.mxu1 %v1997_v40 }
 0x669   :  { %3133 = vmatprep.subr.mxu1 %v1996_v41 }
 0x66a   :  { %3134 = vmatpush3.msra.mxu1 %v1996_v41 }
 0x66b   :  { %3135 = vmatprep.subr.mxu1 %v1995_v42 }
 0x66c   :  { %3136 = vmatpush3.msra.mxu1 %v1995_v42 }
 0x66d   :  { %3137 = vmatprep.subr.mxu1 %v1994_v47 }
 0x66e   :  { %3138 = vmatpush3.msra.mxu1 %v1994_v47 }
 0x66f   :  { %3139 = vmatprep.subr.mxu1 %v1993_v48 }
 0x670   :  { %3140 = vmatpush3.msra.mxu1 %v1993_v48 }
 0x671   :  { %3141 = vmatprep.subr.mxu1 %v1992_v49 }
 0x672   :  { %3142 = vmatpush3.msra.mxu1 %v1992_v49 }
 0x689   :  { %s3150_s24 = spop %3149 }
 0x6c6   :  { %v2019_v22 = vpop.permute.xlu0 %2018 }
 0x6c7   :  { %2510 = vmatmul.mubr.msk.f32.gmra.mxu0 %vm3422_vm5, %v2019_v22 }
 0x6c8   :  { %2511 = vmatprep.mubr.msk.f32.mxu0 %vm264_vm3, %v1965_v18 }
 0x6ca   :  { %v2235_v55 = vpop.permute.xlu0 %2234 }
 0x6cb   :  { %2513 = vmatmul.mubr.msk.f32.gmra.mxu0 %vm3422_vm5, %v2017_v61  ;;  %v2258_v51 = vsel %vm2257_vm6, 0.0, %v2235_v55 }
 0x6cc   :  { %2514 = vmatprep.mubr.msk.f32.mxu0 %vm264_vm3, %v1966_v21 }
 0x6cf   :  { %v2021_v23 = vpop.permute.xlu1 %2020 }
 0x6d0   :  { %2516 = vmatmul.mubr.msk.f32.gmra.mxu0 %vm3422_vm5, %v2021_v23 }
 0x716   :  { %v2104_v25 = vpop.f32.mrf.mxu0 }
 0x717   :  { %v2127_v14 = vadd.f32 %v3603_v24, %v2104_v25 }
 0x718   :  { %v2106_v29 = vpop.f32.mrf.mxu0 }
 0x719   :  { %v2224_v31 = vmul.f32 0.2, %v2127_v14  ;;  %v3115_v50 = vpop.f32.mrf.mxu1 }
 0x71a   :  { %v2221_v21 = vadd.f32 %v3115_v50, %v2522_v16 }
 0x71b   :  { %v2228_v34 = vmax.f32 %v2127_v14, %v2224_v31  ;;  %v2197_v8 = vpop.f32.mrf.mxu1 }
 0x71d   :  { %2245 = vrot.lane.b32.xlu0 %v2228_v34, %s3220_s0  ;;  %2236 = vrot.lane.b32.xlu1 %v2228_v34, %s3221_s23 }
 0x721   :  { %v3118_v9 = vpop.f32.mrf.mxu1 }
 0x722   :  { %v2223_v47 = vadd.f32 %v3118_v9, %v2522_v16 }
 0x723   :  { %v2207_v11 = vpop.f32.mrf.mxu1 }
 0x787   :  { %v2109_v59 = vpop.f32.mrf.mxu0 }
 0x788   :  { %v2128_v45 = vadd.f32 %v3603_v24, %v2109_v59 }
 0x789   :  { %v2111_v39 = vpop.f32.mrf.mxu0 }
 0x78a   :  { %v2225_v56 = vmul.f32 0.2, %v2128_v45 }
 0x78b   :  { %v2114_v57 = vpop.f32.mrf.mxu0 }
 0x78c   :  { %v2229_v32 = vmax.f32 %v2128_v45, %v2225_v56  ;;  %v2129_v58 = vadd.f32 %v3603_v24, %v2114_v57  ;;  %v2222_v45 = vadd.f32 %v2522_v16, %v2207_v11 }
 0x78d   :  { %v2116_v60 = vpop.f32.mrf.mxu0 }
 0x78e   :  { %v2226_v53 = vmul.f32 0.2, %v2129_v58  ;;  %2247 = vrot.lane.b32.xlu1 %v2229_v32, %s3220_s0 }
 0x78f   :  { %v2246_v54 = vpop.permute.xlu0 %2245  ;;  %v2237_v1 = vpop.permute.xlu1 %2236 }
 0x790   :  { %v2230_v62 = vmax.f32 %v2129_v58, %v2226_v53  ;;  %v2119_v46 = vpop.f32.mrf.mxu0  ;;  %v2261_v63 = vsel %vm264_vm3, %v2258_v51, %v2246_v54  ;;  %v2259_v2 = vsel %vm2257_vm6, 0.0, %v2237_v1  ;;  %v2422_v54 = vand.u32 127, %v96_v37 }
 0x791   :  { %v2130_v26 = vadd.f32 %v3603_v24, %v2119_v46  ;;  %3143 = vmatprep.mubr.msk.f32.mxu1 %vm2265_vm7, %v2261_v63  ;;  %v2220_v24 = vadd.f32 %v2522_v16, %v2197_v8  ;;  %v2411_v63 = vstv %s3150_s24 }
 0x792   :  { %2249 = vrot.lane.b32.xlu1 %v2230_v62, %s3220_s0  ;;  %2238 = vrot.lane.b32.xlu0 %v2230_v62, %s3221_s23  ;;  %v2121_v52 = vpop.f32.mrf.mxu0  ;;  %v2427_v46 = vadd.s32 4294967288, %v2422_v54 }
 0x793   :  { %v2227_v43 = vmul.f32 0.2, %v2130_v26  ;;  %v2425_v52 = vsub.s32 %v2422_v54, %v3282_v38 }
 0x794   :  { %v2430_v1 = vsub.s32 %v2427_v46, %v3282_v38 }
 0x795   :  { %v2231_v0 = vmax.f32 %v2130_v26, %v2227_v43 }
 0x797   :  { %2251 = vrot.lane.b32.xlu0 %v2231_v0, %s3220_s0 }
 0x800   :  { %v2248_v20 = vpop.permute.xlu1 %2247 }
 0x801   :  { %v2262_v3 = vsel %vm264_vm3, %v2259_v2, %v2248_v20 }
 0x802   :  { %3144 = vmatmul.mubr.msk.f32.vlgmr.msra.gmra.mxu1 %vm2265_vm7, %v2262_v3 }
 0x804   :  { %v2250_v4 = vpop.permute.xlu1 %2249  ;;  %v2239_v44 = vpop.permute.xlu0 %2238 }
 0x805   :  { %v2263_v5 = vsel %vm264_vm3, %v2258_v51, %v2250_v4  ;;  %v2260_v7 = vsel %vm2257_vm6, 0.0, %v2239_v44 }
 0x806   :  { %3146 = vmatprep.mubr.msk.f32.mxu1 %vm2265_vm7, %v2263_v5 }
 0x809   :  { %v2252_v61 = vpop.permute.xlu0 %2251 }
 0x80a   :  { %v2264_v10 = vsel %vm264_vm3, %v2260_v7, %v2252_v61 }
 0x80b   :  { %3147 = vmatmul.mubr.msk.f32.gmra.mxu1 %vm2265_vm7, %v2264_v10 }
 0x8c2   :  { %v3145_v13 = vpop.f32.mrf.mxu1 }
 0x8c3   :  { %v2368_v15 = vadd.f32 %v3145_v13, %v2527_v12 }
 0x8c4   :  { %v2344_v17 = vpop.f32.mrf.mxu1 }
 0x8c5   :  { %v2372_v18 = vmul.f32 0.2, %v2368_v15  ;;  %v2367_v19 = vadd.f32 %v2527_v12, %v2344_v17 }
 0x8c7   :  { %v2376_v22 = vmax.f32 %v2368_v15, %v2372_v18  ;;  %v2371_v23 = vmul.f32 0.2, %v2367_v19 }
 0x8c9   :  { %v2380_v25 = vadd.f32 %v2376_v22, %v2221_v21  ;;  %v2375_v14 = vmax.f32 %v2367_v19, %v2371_v23 }
 0x8cb   :  { %v2379_v28 = vadd.f32 %v2375_v14, %v2220_v24  ;;  %v3148_v29 = vpop.f32.mrf.mxu1  ;;  %v2384_v31 = vmax.f32 %v2380_v25, 0.0 }
 0x8cc   :  { %v2370_v33 = vadd.f32 %v3148_v29, %v2527_v12 }
 0x8cd   :  { %v2354_v34 = vpop.f32.mrf.mxu1  ;;  %v2394_v35 = vmul.f32 %v2528_v27, %v2384_v31  ;;  %v2383_v30 = vmax.f32 %v2379_v28, 0.0 }
 0x8ce   :  { %v2374_v36 = vmul.f32 0.2, %v2370_v33  ;;  %v2369_v40 = vadd.f32 %v2527_v12, %v2354_v34 }
 0x8cf   :  { %v2400_v41 = vsel %vm2257_vm6, %v2394_v35, 0.0  ;;  %v2393_v42 = vmul.f32 %v2528_v27, %v2383_v30 }
 0x8d0   :  { %v2378_v48 = vmax.f32 %v2370_v33, %v2374_v36  ;;  %v2373_v49 = vmul.f32 0.2, %v2369_v40  ;;  %2401 = vadd.xlane.f32.xlu0 %v2400_v41 }
 0x8d1   :  { %v2397_v59 = vsel %vm2257_vm6, %v2393_v42, 0.0 }
 0x8d2   :  { %v2382_v39 = vadd.f32 %v2378_v48, %v2223_v47  ;;  %v2377_v55 = vmax.f32 %v2369_v40, %v2373_v49  ;;  %2398 = vadd.xlane.f32.xlu1 %v2397_v59 }
 0x8d4   :  { %v2381_v56 = vadd.f32 %v2377_v55, %v2222_v45  ;;  %v2386_v57 = vmax.f32 %v2382_v39, 0.0 }
 0x8d6   :  { %v2396_v32 = vmul.f32 %v2528_v27, %v2386_v57  ;;  %v2385_v58 = vmax.f32 %v2381_v56, 0.0 }
 0x8d8   :  { %v2406_v60 = vsel %vm2257_vm6, %v2396_v32, 0.0  ;;  %v2395_v51 = vmul.f32 %v2528_v27, %v2385_v58 }
 0x8d9   :  { %2407 = vadd.xlane.f32.xlu1 %v2406_v60 }
 0x8da   :  { %v2403_v53 = vsel %vm2257_vm6, %v2395_v51, 0.0 }
 0x8db   :  { %2404 = vadd.xlane.f32.xlu0 %v2403_v53 }
 0x959   :  { %v2402_v26 = vpop.xlane.xlu0 %2401 }
 0x95a   :  { %v2414_v2 = vadd.f32 %v2411_v63, %v2402_v26 }
 0x95b   :  { %v2399_v62 = vpop.xlane.xlu1 %2398 }
 0x95c   :  { %v2413_v43 = vadd.f32 %v2411_v63, %v2399_v62  ;;  %v2431_v37 = vrot.slane %v2414_v2, %v2430_v1 }
 0x95e   :  { %v2426_v4 = vrot.slane %v2413_v43, %v2425_v52 }
 0x960   :  { %v2433_v61 = vsel %vm2432_vm8, %v2431_v37, %v2426_v4 }
 0x962   :  { %v2408_v0 = vpop.xlane.xlu1 %2407 }
 0x963   :  { %v2416_v20 = vadd.f32 %v2411_v63, %v2408_v0 }
 0x964   :  { %v2405_v3 = vpop.xlane.xlu0 %2404 }
 0x965   :  { %v2415_v44 = vadd.f32 %v2411_v63, %v2405_v3  ;;  %v2441_v5 = vrot.slane %v2416_v20, %v2430_v1 }
 0x967   :  { %v2437_v7 = vrot.slane %v2415_v44, %v2425_v52 }
 0x969   :  { %v2442_v10 = vsel %vm2432_vm8, %v2441_v5, %v2437_v7 }
 0x96a   :  { %v2444_v6 = vsel %vm2443_vm9, %v2442_v10, %v2433_v61 }
 0x96b   :  { %2447 = vst.msk [vmem:[#allocation5] sm:$0x3] %vm2446_vm10, %v2444_v6 }
 0x96c   :  { %3202 = shalt.err (!%p3199_p9)
}
 0x96d   :  { %2457 = dma.vmem_to_hbm [thread:$0]  %s2455_s26, 32, %s3638_s2, [#allocation4]  }
 0x96e   :  { %3213 = dma.done.wait [#allocation4], 32  }
 0x96f   :  { %3214 = vsyncadd [#allocation4], 4294967264 }
 0x970   :  { %2461 = vsyncpa [#allocation3], 1 }
 0x971   :  { %2462 = vsyncpa [#allocation4], 1 }

</bundles_post_ra>
